<compile_context>
chip_gen: v7x
topology: tpu7x:2x2x1
jax: 0.10.0
libtpu: 0.0.40
codegen_flags: <defaults>
</compile_context>

<pallas_src>
import math
import functools

import jax
import jax.numpy as jnp
from jax.experimental import pallas as pl
from jax.experimental.pallas import tpu as pltpu


_SQRT_2 = math.sqrt(2.0)
_SQRT_2_OVER_PI = 0.7978845608028654


def _erf(x, approx_recip=False):
    """erf approximation (Abramowitz & Stegun 7.1.26, |err| <= 1.5e-7).

    Pure VPU/EUP ops (abs/select/mul/add/exp + reciprocal); the reciprocal can
    be routed to the EUP (approx=True) on the fast path.
    """
    a1, a2, a3, a4, a5 = (0.254829592, -0.284496736, 1.421413741,
                          -1.453152027, 1.061405429)
    p = 0.3275911
    s = jnp.where(x >= 0.0, 1.0, -1.0)
    ax = jnp.abs(x)
    t = pl.reciprocal(1.0 + p * ax, approx=approx_recip)
    poly = ((((a5 * t + a4) * t + a3) * t + a2) * t + a1) * t
    return s * (1.0 - poly * jnp.exp(-ax * ax))


def _bert_layer_kernel(x_ref, mask_ref, wqkv_ref, wo_ref, wi_ref, wo2_ref,
                       vec_ref, out_ref, q_scr, k_scr, v_scr, ctx_scr, *,
                       num_heads, approx_recip, use_tanh_gelu, ln_eps):
    # x_ref:    (1, S, E) hidden states for batch b (f32)
    # mask_ref: (1, 1, 1, S) additive attention mask for batch b (f32)
    # weights:  grid-invariant, single-buffered, resident in VMEM
    # vec_ref:  (8, Nmax) packed f32 [bqkv, bo, ln1_w, ln1_b, bi, bo2, ln2_w, ln2_b]
    # out_ref:  (1, S, E) final BertLayer output (lane-dense last dim)
    # *_scr:    (H, S, D) head-major f32 VMEM scratch for Q/K/V/context
    S = x_ref.shape[1]
    E = x_ref.shape[2]
    I = wi_ref.shape[1]
    H = num_heads
    D = E // H
    cdt = wqkv_ref.dtype                       # MXU operand dtype (f32 / bf16)

    x = x_ref[0]                               # (S, E) f32
    # additive mask broadcast ONCE (hoisted out of the head loop)
    mask_full = jnp.broadcast_to(mask_ref[0, 0], (S, S)).astype(jnp.float32)

    def mm(a, b):                              # MXU matmul, f32 accumulation
        return jnp.dot(a.astype(cdt), b.astype(cdt),
                       preferred_element_type=jnp.float32)

    def qk(a, b):                              # (S,D) x (S,D) -> (S,S), no k.T
        return jax.lax.dot_general(
            a.astype(cdt), b.astype(cdt),
            dimension_numbers=(((1,), (1,)), ((), ())),
            preferred_element_type=jnp.float32)

    def layer_norm(y, gamma, beta):            # f32 throughout
        u = jnp.mean(y, axis=-1, keepdims=True)
        c = y - u
        var = jnp.mean(c * c, axis=-1, keepdims=True)
        return c * jax.lax.rsqrt(var + ln_eps) * gamma + beta

    # packed bias / LayerNorm rows (static lane slices of one resident tile)
    bqkv = vec_ref[0:1, 0:3 * E]
    bo = vec_ref[1:2, 0:E]
    g1 = vec_ref[2:3, 0:E]
    b1 = vec_ref[3:4, 0:E]
    bi = vec_ref[4:5, 0:I]
    bo2 = vec_ref[5:6, 0:E]
    g2 = vec_ref[6:7, 0:E]
    b2 = vec_ref[7:8, 0:E]

    # ---- fused Q/K/V projection: one (S, E) @ (E, 3E) MXU pass ----
    # (1/sqrt(D) already folded into the Q columns / bq at prep time)
    qkv = mm(x, wqkv_ref[...]) + bqkv          # (S, 3E) f32

    # Unpack to head-major scratch so the head loop only uses leading-dim
    # (tile-address) dynamic indexing.
    for h in range(H):
        lo = h * D
        q_scr[h] = qkv[:, lo:lo + D]
        k_scr[h] = qkv[:, E + lo:E + lo + D]
        v_scr[h] = qkv[:, 2 * E + lo:2 * E + lo + D]

    # ---- per-head scaled-dot-product attention (bounded live ranges) ----
    @pl.loop(0, H)
    def _(h):
        scores = qk(q_scr[h], k_scr[h]) + mask_full          # (S, S) f32
        m = jnp.max(scores, axis=-1, keepdims=True)
        e = jnp.exp(scores - m)
        denom = jnp.sum(e, axis=-1, keepdims=True)
        probs = e * pl.reciprocal(denom, approx=approx_recip)
        # dropout(probs) == identity (eval / p = 0)
        ctx_scr[h] = mm(probs, v_scr[h])                     # (S, D)

    # head-major -> lane-major concat == torch permute(0,2,1,3) + view
    ctx = jnp.concatenate([ctx_scr[h] for h in range(H)], axis=-1)   # (S, E)

    # ---- BertSelfOutput: dense + (dropout=id) + residual + LayerNorm ----
    attn_out = layer_norm(mm(ctx, wo_ref[...]) + bo + x, g1, b1)

    # ---- BertIntermediate: dense + GELU ----
    inter = mm(attn_out, wi_ref[...]) + bi
    if use_tanh_gelu:
        # tanh-form GELU: transcendental goes to the otherwise-idle EUP slot
        inter = 0.5 * inter * (1.0 + jnp.tanh(
            _SQRT_2_OVER_PI * (inter + 0.044715 * inter * inter * inter)))
    else:
        # exact-erf GELU matching the PyTorch module (A&S poly, |err|<=1.5e-7)
        inter = inter * 0.5 * (1.0 + _erf(inter * (1.0 / _SQRT_2), approx_recip))

    # ---- BertOutput: dense + (dropout=id) + residual + LayerNorm ----
    out_ref[0] = layer_norm(mm(inter, wo2_ref[...]) + bo2 + attn_out,
                            g2, b2).astype(out_ref.dtype)


def prepare_bert_layer_params(params, num_attention_heads,
                              compute_dtype=jnp.bfloat16):
    """One-time weight preparation (cache the result; do not redo per call).

    * Fuses wq/wk/wv into one (E, 3E) weight with 1/sqrt(D) folded into the
      Q columns (and bq).
    * Casts matmul weights to `compute_dtype` (bf16 default: MXU-native,
      halves weight DMA / resident VMEM).
    * Packs all bias / LayerNorm vectors into one (8, Nmax) f32 tile.
    """
    E = params["wq"].shape[0]
    I = params["wi"].shape[1]
    assert E % num_attention_heads == 0
    D = E // num_attention_heads
    scale = 1.0 / math.sqrt(D)

    wqkv = jnp.concatenate(
        [jnp.asarray(params["wq"]) * scale, params["wk"], params["wv"]], axis=1)
    bqkv = jnp.concatenate(
        [jnp.asarray(params["bq"]) * scale, params["bk"], params["bv"]], axis=0)

    n_max = max(3 * E, I)

    def row(v):
        v = jnp.asarray(v, jnp.float32).reshape(-1)
        return jnp.pad(v, (0, n_max - v.shape[0]))

    vecs = jnp.stack([
        row(bqkv), row(params["bo"]), row(params["ln1_w"]), row(params["ln1_b"]),
        row(params["bi"]), row(params["bo2"]), row(params["ln2_w"]),
        row(params["ln2_b"]),
    ])                                                       # (8, Nmax) f32

    return {
        "wqkv": wqkv.astype(compute_dtype),
        "wo": jnp.asarray(params["wo"]).astype(compute_dtype),
        "wi": jnp.asarray(params["wi"]).astype(compute_dtype),
        "wo2": jnp.asarray(params["wo2"]).astype(compute_dtype),
        "vecs": vecs,
    }


def bert_layer(hidden_states, attention_mask, prepared, num_attention_heads, *,
               approx_softmax_recip=True, use_tanh_gelu=False,
               single_buffer_weights=True):
    """Pallas implementation of BertLayer.forward (eval mode).

    hidden_states:  (B, S, E) float32
    attention_mask: (B, 1, 1, S) float32 additive mask
    prepared:       output of prepare_bert_layer_params (weights pre-cast)
    Returns layer_output of shape (B, S, E), float32.
    """
    B, S, E = hidden_states.shape
    H = num_attention_heads
    assert E % H == 0
    D = E // H
    I = prepared["wi"].shape[1]
    n_max = prepared["vecs"].shape[1]

    kernel = functools.partial(
        _bert_layer_kernel,
        num_heads=H,
        approx_recip=approx_softmax_recip,
        use_tanh_gelu=use_tanh_gelu,
        ln_eps=1e-12,
    )

    # VMEM limit derived from resident bytes + headroom (not a hard-coded max).
    cbytes = jnp.dtype(prepared["wqkv"].dtype).itemsize
    weight_bytes = cbytes * int(prepared["wqkv"].size + prepared["wo"].size +
                                prepared["wi"].size + prepared["wo2"].size)
    weight_bytes += 4 * int(prepared["vecs"].size)
    d_pad = -(-D // 128) * 128
    s_pad = -(-S // 8) * 8
    scratch_bytes = 4 * 4 * H * s_pad * d_pad                 # q/k/v/ctx scratch
    act_bytes = 2 * 4 * (2 * S * E + 128)                     # dbl-buffered x/out/mask
    tmp_bytes = 4 * (3 * S * E + S * S + S * I + 4 * S * E)   # in-flight temporaries
    vmem_limit = int(1.5 * (weight_bytes + scratch_bytes + act_bytes + tmp_bytes))
    vmem_limit = min(max(vmem_limit, 32 * 1024 * 1024), 128 * 1024 * 1024)

    def batch_spec(shape):
        n = len(shape)
        return pl.BlockSpec(shape, lambda b, n=n: (b,) + (0,) * (n - 1))

    def _call(single_buffered):
        def const_spec(shape):
            n = len(shape)
            kwargs = {"pipeline_mode": pl.Buffered(1)} if single_buffered else {}
            return pl.BlockSpec(shape, lambda b, n=n: (0,) * n, **kwargs)

        return pl.pallas_call(
            kernel,
            out_shape=jax.ShapeDtypeStruct((B, S, E), jnp.float32),
            grid_spec=pltpu.PrefetchScalarGridSpec(
                num_scalar_prefetch=0,
                grid=(B,),
                in_specs=[
                    batch_spec((1, S, E)),          # hidden_states
                    batch_spec((1, 1, 1, S)),       # additive attention mask
                    const_spec((E, 3 * E)),         # fused QKV weight
                    const_spec((E, E)),             # attention output dense
                    const_spec((E, I)),             # intermediate dense
                    const_spec((I, E)),             # FFN output dense
                    const_spec((8, n_max)),         # packed biases / LN params
                ],
                out_specs=batch_spec((1, S, E)),
                scratch_shapes=[
                    pltpu.VMEM((H, S, D), jnp.float32),   # Q head-major
                    pltpu.VMEM((H, S, D), jnp.float32),   # K head-major
                    pltpu.VMEM((H, S, D), jnp.float32),   # V head-major
                    pltpu.VMEM((H, S, D), jnp.float32),   # per-head context
                ],
            ),
            compiler_params=pltpu.CompilerParams(
                dimension_semantics=("parallel",),
                vmem_limit_bytes=vmem_limit,
            ),
        )(hidden_states.astype(jnp.float32),
          attention_mask.astype(jnp.float32),
          prepared["wqkv"], prepared["wo"], prepared["wi"], prepared["wo2"],
          prepared["vecs"])

    if single_buffer_weights:
        try:
            return jax.block_until_ready(_call(True))
        except Exception:  # pragma: no cover - fall back if Buffered(1) unsupported
            pass
    return _call(False)


def _reference(hidden_states, attention_mask, params, H):
    """Pure-JAX (f32) reference mirroring the PyTorch BertLayer.forward."""
    B, S, E = hidden_states.shape
    D = E // H

    q = hidden_states @ params["wq"] + params["bq"]
    k = hidden_states @ params["wk"] + params["bk"]
    v = hidden_states @ params["wv"] + params["bv"]

    def split(x):
        return jnp.transpose(x.reshape(B, S, H, D), (0, 2, 1, 3))

    q, k, v = split(q), split(k), split(v)
    scores = jnp.einsum("bhqd,bhkd->bhqk", q, k) / math.sqrt(D) + attention_mask
    probs = jax.nn.softmax(scores, axis=-1)
    ctx = jnp.einsum("bhqk,bhkd->bhqd", probs, v)
    ctx = jnp.transpose(ctx, (0, 2, 1, 3)).reshape(B, S, E)

    def ln(x, wt, bs):
        u = x.mean(-1, keepdims=True)
        s = ((x - u) ** 2).mean(-1, keepdims=True)
        return (x - u) / jnp.sqrt(s + 1e-12) * wt + bs

    attn = ln(ctx @ params["wo"] + params["bo"] + hidden_states,
              params["ln1_w"], params["ln1_b"])
    inter = attn @ params["wi"] + params["bi"]
    inter = inter * 0.5 * (1.0 + jax.scipy.special.erf(inter / math.sqrt(2.0)))
    out = ln(inter @ params["wo2"] + params["bo2"] + attn,
             params["ln2_w"], params["ln2_b"])
    return out


if __name__ == "__main__":
    # config: hidden_size=32, num_attention_heads=4, intermediate_size=128
    B, S, E, H = 2, 8, 32, 4
    I = 4 * E

    key = jax.random.PRNGKey(0)
    ks = jax.random.split(key, 20)

    def lin(kw, kb, fan_in, fan_out):    # nn.Linear default init range
        bound = 1.0 / math.sqrt(fan_in)
        return (jax.random.uniform(kw, (fan_in, fan_out), jnp.float32, -bound, bound),
                jax.random.uniform(kb, (fan_out,), jnp.float32, -bound, bound))

    wq, bq = lin(ks[0], ks[1], E, E)
    wk, bk = lin(ks[2], ks[3], E, E)
    wv, bv = lin(ks[4], ks[5], E, E)
    wo, bo = lin(ks[6], ks[7], E, E)
    wi, bi = lin(ks[8], ks[9], E, I)
    wo2, bo2 = lin(ks[10], ks[11], I, E)

    params = {
        "wq": wq, "bq": bq, "wk": wk, "bk": bk, "wv": wv, "bv": bv,
        "wo": wo, "bo": bo,
        "ln1_w": 1.0 + 0.1 * jax.random.normal(ks[12], (E,), jnp.float32),
        "ln1_b": 0.1 * jax.random.normal(ks[13], (E,), jnp.float32),
        "wi": wi, "bi": bi, "wo2": wo2, "bo2": bo2,
        "ln2_w": 1.0 + 0.1 * jax.random.normal(ks[14], (E,), jnp.float32),
        "ln2_b": 0.1 * jax.random.normal(ks[15], (E,), jnp.float32),
    }

    hidden_states = jax.random.normal(ks[16], (B, S, E), jnp.float32)
    # BERT-style additive mask: 0 visible, -10000 masked.  Shape (B, 1, 1, S).
    keep = (jax.random.uniform(ks[17], (B, S)) > 0.2).astype(jnp.float32)
    attention_mask = ((1.0 - keep) * -10000.0)[:, None, None, :]

    ref = _reference(hidden_states, attention_mask, params, H)

    # f32 MXU operands, exact softmax recip + exact-erf GELU: tight check.
    prep_f32 = prepare_bert_layer_params(params, H, compute_dtype=jnp.float32)
    out_f32 = jax.block_until_ready(
        bert_layer(hidden_states, attention_mask, prep_f32, H,
                   approx_softmax_recip=False, use_tanh_gelu=False))
    assert out_f32.shape == (B, S, E)
    err_f32 = float(jnp.max(jnp.abs(out_f32 - ref)))
    assert jnp.allclose(out_f32, ref, atol=1e-3, rtol=1e-3), (
        "f32 kernel mismatch vs reference: max abs err = %e" % err_f32)

    # bf16 MXU fast path: approx softmax recip (default) + tanh GELU, f32 accum.
    prep_bf16 = prepare_bert_layer_params(params, H, compute_dtype=jnp.bfloat16)
    out_fast = jax.block_until_ready(
        bert_layer(hidden_states, attention_mask, prep_bf16, H,
                   use_tanh_gelu=True))
    err_fast = float(jnp.max(jnp.abs(out_fast - ref)))
    assert jnp.allclose(out_fast, ref, atol=1.5e-1, rtol=1.5e-1), (
        "bf16 kernel mismatch vs reference: max abs err = %e" % err_fast)

    print("KERNEL_OK")
</pallas_src>

<mosaic_0001>
module attributes {stable_mosaic.version = 11 : i64} {
  func.func @_bert_layer_kernel(%arg0: i32, %arg1: memref<1x8x32xf32, #tpu.memory_space<vmem>>, %arg2: memref<1x1x1x8xf32, #tpu.memory_space<vmem>>, %arg3: memref<32x96xf32, #tpu.memory_space<vmem>>, %arg4: memref<32x32xf32, #tpu.memory_space<vmem>>, %arg5: memref<32x128xf32, #tpu.memory_space<vmem>>, %arg6: memref<128x32xf32, #tpu.memory_space<vmem>>, %arg7: memref<8x128xf32, #tpu.memory_space<vmem>>, %arg8: memref<1x8x32xf32, #tpu.memory_space<vmem>>, %arg9: memref<4x8x8xf32, #tpu.memory_space<vmem>>, %arg10: memref<4x8x8xf32, #tpu.memory_space<vmem>>, %arg11: memref<4x8x8xf32, #tpu.memory_space<vmem>>, %arg12: memref<4x8x8xf32, #tpu.memory_space<vmem>>) attributes {dimension_semantics = [#tpu.dimension_semantics<parallel>], iteration_bounds = array<i64: 2>, scalar_prefetch = 0 : i64, scratch_operands = 4 : i64, tpu.core_type = #tpu.core_type<tc>, window_params = [{transform_indices = @transform_0, window_bounds = array<i64: 1, 8, 32>}, {transform_indices = @transform_1, window_bounds = array<i64: 1, 1, 1, 8>}, {pipeline_mode = #tpu.pipeline_mode<synchronous>, transform_indices = @transform_2, window_bounds = array<i64: 32, 96>}, {pipeline_mode = #tpu.pipeline_mode<synchronous>, transform_indices = @transform_3, window_bounds = array<i64: 32, 32>}, {pipeline_mode = #tpu.pipeline_mode<synchronous>, transform_indices = @transform_4, window_bounds = array<i64: 32, 128>}, {pipeline_mode = #tpu.pipeline_mode<synchronous>, transform_indices = @transform_5, window_bounds = array<i64: 128, 32>}, {pipeline_mode = #tpu.pipeline_mode<synchronous>, transform_indices = @transform_6, window_bounds = array<i64: 8, 128>}, {transform_indices = @transform_7, window_bounds = array<i64: 1, 8, 32>}]} {
    %c0 = arith.constant 0 : index
    %c0_0 = arith.constant 0 : index
    %c0_1 = arith.constant 0 : index
    %0 = vector.load %arg1[%c0, %c0_0, %c0_1] : memref<1x8x32xf32, #tpu.memory_space<vmem>>, vector<1x8x32xf32>
    %1 = vector.shape_cast %0 : vector<1x8x32xf32> to vector<8x32xf32>
    %c0_2 = arith.constant 0 : index
    %c0_3 = arith.constant 0 : index
    %c0_4 = arith.constant 0 : index
    %c0_5 = arith.constant 0 : index
    %2 = vector.load %arg2[%c0_2, %c0_3, %c0_4, %c0_5] : memref<1x1x1x8xf32, #tpu.memory_space<vmem>>, vector<1x1x1x8xf32>
    %3 = vector.shape_cast %2 : vector<1x1x1x8xf32> to vector<1x8xf32>
    %4 = vector.shape_cast %3 : vector<1x8xf32> to vector<1x8xf32>
    %5 = vector.broadcast %4 : vector<1x8xf32> to vector<8x8xf32>
    %c0_6 = arith.constant 0 : index
    %c0_7 = arith.constant 0 : index
    %6 = vector.load %arg7[%c0_6, %c0_7] : memref<8x128xf32, #tpu.memory_space<vmem>>, vector<1x96xf32>
    %c1 = arith.constant 1 : index
    %c0_8 = arith.constant 0 : index
    %7 = vector.load %arg7[%c1, %c0_8] : memref<8x128xf32, #tpu.memory_space<vmem>>, vector<1x32xf32>
    %c2 = arith.constant 2 : index
    %c0_9 = arith.constant 0 : index
    %8 = vector.load %arg7[%c2, %c0_9] : memref<8x128xf32, #tpu.memory_space<vmem>>, vector<1x32xf32>
    %c3 = arith.constant 3 : index
    %c0_10 = arith.constant 0 : index
    %9 = vector.load %arg7[%c3, %c0_10] : memref<8x128xf32, #tpu.memory_space<vmem>>, vector<1x32xf32>
    %c4 = arith.constant 4 : index
    %c0_11 = arith.constant 0 : index
    %10 = vector.load %arg7[%c4, %c0_11] : memref<8x128xf32, #tpu.memory_space<vmem>>, vector<1x128xf32>
    %c5 = arith.constant 5 : index
    %c0_12 = arith.constant 0 : index
    %11 = vector.load %arg7[%c5, %c0_12] : memref<8x128xf32, #tpu.memory_space<vmem>>, vector<1x32xf32>
    %c6 = arith.constant 6 : index
    %c0_13 = arith.constant 0 : index
    %12 = vector.load %arg7[%c6, %c0_13] : memref<8x128xf32, #tpu.memory_space<vmem>>, vector<1x32xf32>
    %c7 = arith.constant 7 : index
    %c0_14 = arith.constant 0 : index
    %13 = vector.load %arg7[%c7, %c0_14] : memref<8x128xf32, #tpu.memory_space<vmem>>, vector<1x32xf32>
    %c0_15 = arith.constant 0 : index
    %c0_16 = arith.constant 0 : index
    %14 = vector.load %arg3[%c0_15, %c0_16] : memref<32x96xf32, #tpu.memory_space<vmem>>, vector<32x96xf32>
    %cst = arith.constant dense<0.000000e+00> : vector<8x96xf32>
    %15 = tpu.matmul %1, %14, %cst {dimension_numbers = #tpu.dot_dimension_numbers<[1], [0], [0], [1], [0, 0, 1, 1], [], []>} : vector<8x32xf32>, vector<32x96xf32>, vector<8x96xf32> -> vector<8x96xf32>
    %16 = vector.broadcast %6 : vector<1x96xf32> to vector<8x96xf32>
    %17 = arith.addf %15, %16 : vector<8x96xf32>
    %18 = vector.extract_strided_slice %17 {offsets = [0, 0], sizes = [8, 8], strides = [1, 1]} : vector<8x96xf32> to vector<8x8xf32>
    %c0_17 = arith.constant 0 : index
    %c0_18 = arith.constant 0 : index
    %c0_19 = arith.constant 0 : index
    %19 = vector.load %arg9[%c0_17, %c0_18, %c0_19] : memref<4x8x8xf32, #tpu.memory_space<vmem>>, vector<1x8x8xf32>
    %20 = vector.shape_cast %19 : vector<1x8x8xf32> to vector<8x8xf32>
    %21 = vector.shape_cast %18 : vector<8x8xf32> to vector<1x8x8xf32>
    tpu.vector_store %arg9[%c0_17, %c0_18, %c0_19], %21 {strides = array<i32>} : memref<4x8x8xf32, #tpu.memory_space<vmem>>, vector<1x8x8xf32>,
    %22 = vector.extract_strided_slice %17 {offsets = [0, 32], sizes = [8, 8], strides = [1, 1]} : vector<8x96xf32> to vector<8x8xf32>
    %c0_20 = arith.constant 0 : index
    %c0_21 = arith.constant 0 : index
    %c0_22 = arith.constant 0 : index
    %23 = vector.load %arg10[%c0_20, %c0_21, %c0_22] : memref<4x8x8xf32, #tpu.memory_space<vmem>>, vector<1x8x8xf32>
    %24 = vector.shape_cast %23 : vector<1x8x8xf32> to vector<8x8xf32>
    %25 = vector.shape_cast %22 : vector<8x8xf32> to vector<1x8x8xf32>
    tpu.vector_store %arg10[%c0_20, %c0_21, %c0_22], %25 {strides = array<i32>} : memref<4x8x8xf32, #tpu.memory_space<vmem>>, vector<1x8x8xf32>,
    %26 = vector.extract_strided_slice %17 {offsets = [0, 64], sizes = [8, 8], strides = [1, 1]} : vector<8x96xf32> to vector<8x8xf32>
    %c0_23 = arith.constant 0 : index
    %c0_24 = arith.constant 0 : index
    %c0_25 = arith.constant 0 : index
    %27 = vector.load %arg11[%c0_23, %c0_24, %c0_25] : memref<4x8x8xf32, #tpu.memory_space<vmem>>, vector<1x8x8xf32>
    %28 = vector.shape_cast %27 : vector<1x8x8xf32> to vector<8x8xf32>
    %29 = vector.shape_cast %26 : vector<8x8xf32> to vector<1x8x8xf32>
    tpu.vector_store %arg11[%c0_23, %c0_24, %c0_25], %29 {strides = array<i32>} : memref<4x8x8xf32, #tpu.memory_space<vmem>>, vector<1x8x8xf32>,
    %30 = vector.extract_strided_slice %17 {offsets = [0, 8], sizes = [8, 8], strides = [1, 1]} : vector<8x96xf32> to vector<8x8xf32>
    %c1_26 = arith.constant 1 : index
    %c0_27 = arith.constant 0 : index
    %c0_28 = arith.constant 0 : index
    %31 = vector.load %arg9[%c1_26, %c0_27, %c0_28] : memref<4x8x8xf32, #tpu.memory_space<vmem>>, vector<1x8x8xf32>
    %32 = vector.shape_cast %31 : vector<1x8x8xf32> to vector<8x8xf32>
    %33 = vector.shape_cast %30 : vector<8x8xf32> to vector<1x8x8xf32>
    tpu.vector_store %arg9[%c1_26, %c0_27, %c0_28], %33 {strides = array<i32>} : memref<4x8x8xf32, #tpu.memory_space<vmem>>, vector<1x8x8xf32>,
    %34 = vector.extract_strided_slice %17 {offsets = [0, 40], sizes = [8, 8], strides = [1, 1]} : vector<8x96xf32> to vector<8x8xf32>
    %c1_29 = arith.constant 1 : index
    %c0_30 = arith.constant 0 : index
    %c0_31 = arith.constant 0 : index
    %35 = vector.load %arg10[%c1_29, %c0_30, %c0_31] : memref<4x8x8xf32, #tpu.memory_space<vmem>>, vector<1x8x8xf32>
    %36 = vector.shape_cast %35 : vector<1x8x8xf32> to vector<8x8xf32>
    %37 = vector.shape_cast %34 : vector<8x8xf32> to vector<1x8x8xf32>
    tpu.vector_store %arg10[%c1_29, %c0_30, %c0_31], %37 {strides = array<i32>} : memref<4x8x8xf32, #tpu.memory_space<vmem>>, vector<1x8x8xf32>,
    %38 = vector.extract_strided_slice %17 {offsets = [0, 72], sizes = [8, 8], strides = [1, 1]} : vector<8x96xf32> to vector<8x8xf32>
    %c1_32 = arith.constant 1 : index
    %c0_33 = arith.constant 0 : index
    %c0_34 = arith.constant 0 : index
    %39 = vector.load %arg11[%c1_32, %c0_33, %c0_34] : memref<4x8x8xf32, #tpu.memory_space<vmem>>, vector<1x8x8xf32>
    %40 = vector.shape_cast %39 : vector<1x8x8xf32> to vector<8x8xf32>
    %41 = vector.shape_cast %38 : vector<8x8xf32> to vector<1x8x8xf32>
    tpu.vector_store %arg11[%c1_32, %c0_33, %c0_34], %41 {strides = array<i32>} : memref<4x8x8xf32, #tpu.memory_space<vmem>>, vector<1x8x8xf32>,
    %42 = vector.extract_strided_slice %17 {offsets = [0, 16], sizes = [8, 8], strides = [1, 1]} : vector<8x96xf32> to vector<8x8xf32>
    %c2_35 = arith.constant 2 : index
    %c0_36 = arith.constant 0 : index
    %c0_37 = arith.constant 0 : index
    %43 = vector.load %arg9[%c2_35, %c0_36, %c0_37] : memref<4x8x8xf32, #tpu.memory_space<vmem>>, vector<1x8x8xf32>
    %44 = vector.shape_cast %43 : vector<1x8x8xf32> to vector<8x8xf32>
    %45 = vector.shape_cast %42 : vector<8x8xf32> to vector<1x8x8xf32>
    tpu.vector_store %arg9[%c2_35, %c0_36, %c0_37], %45 {strides = array<i32>} : memref<4x8x8xf32, #tpu.memory_space<vmem>>, vector<1x8x8xf32>,
    %46 = vector.extract_strided_slice %17 {offsets = [0, 48], sizes = [8, 8], strides = [1, 1]} : vector<8x96xf32> to vector<8x8xf32>
    %c2_38 = arith.constant 2 : index
    %c0_39 = arith.constant 0 : index
    %c0_40 = arith.constant 0 : index
    %47 = vector.load %arg10[%c2_38, %c0_39, %c0_40] : memref<4x8x8xf32, #tpu.memory_space<vmem>>, vector<1x8x8xf32>
    %48 = vector.shape_cast %47 : vector<1x8x8xf32> to vector<8x8xf32>
    %49 = vector.shape_cast %46 : vector<8x8xf32> to vector<1x8x8xf32>
    tpu.vector_store %arg10[%c2_38, %c0_39, %c0_40], %49 {strides = array<i32>} : memref<4x8x8xf32, #tpu.memory_space<vmem>>, vector<1x8x8xf32>,
    %50 = vector.extract_strided_slice %17 {offsets = [0, 80], sizes = [8, 8], strides = [1, 1]} : vector<8x96xf32> to vector<8x8xf32>
    %c2_41 = arith.constant 2 : index
    %c0_42 = arith.constant 0 : index
    %c0_43 = arith.constant 0 : index
    %51 = vector.load %arg11[%c2_41, %c0_42, %c0_43] : memref<4x8x8xf32, #tpu.memory_space<vmem>>, vector<1x8x8xf32>
    %52 = vector.shape_cast %51 : vector<1x8x8xf32> to vector<8x8xf32>
    %53 = vector.shape_cast %50 : vector<8x8xf32> to vector<1x8x8xf32>
    tpu.vector_store %arg11[%c2_41, %c0_42, %c0_43], %53 {strides = array<i32>} : memref<4x8x8xf32, #tpu.memory_space<vmem>>, vector<1x8x8xf32>,
    %54 = vector.extract_strided_slice %17 {offsets = [0, 24], sizes = [8, 8], strides = [1, 1]} : vector<8x96xf32> to vector<8x8xf32>
    %c3_44 = arith.constant 3 : index
    %c0_45 = arith.constant 0 : index
    %c0_46 = arith.constant 0 : index
    %55 = vector.load %arg9[%c3_44, %c0_45, %c0_46] : memref<4x8x8xf32, #tpu.memory_space<vmem>>, vector<1x8x8xf32>
    %56 = vector.shape_cast %55 : vector<1x8x8xf32> to vector<8x8xf32>
    %57 = vector.shape_cast %54 : vector<8x8xf32> to vector<1x8x8xf32>
    tpu.vector_store %arg9[%c3_44, %c0_45, %c0_46], %57 {strides = array<i32>} : memref<4x8x8xf32, #tpu.memory_space<vmem>>, vector<1x8x8xf32>,
    %58 = vector.extract_strided_slice %17 {offsets = [0, 56], sizes = [8, 8], strides = [1, 1]} : vector<8x96xf32> to vector<8x8xf32>
    %c3_47 = arith.constant 3 : index
    %c0_48 = arith.constant 0 : index
    %c0_49 = arith.constant 0 : index
    %59 = vector.load %arg10[%c3_47, %c0_48, %c0_49] : memref<4x8x8xf32, #tpu.memory_space<vmem>>, vector<1x8x8xf32>
    %60 = vector.shape_cast %59 : vector<1x8x8xf32> to vector<8x8xf32>
    %61 = vector.shape_cast %58 : vector<8x8xf32> to vector<1x8x8xf32>
    tpu.vector_store %arg10[%c3_47, %c0_48, %c0_49], %61 {strides = array<i32>} : memref<4x8x8xf32, #tpu.memory_space<vmem>>, vector<1x8x8xf32>,
    %62 = vector.extract_strided_slice %17 {offsets = [0, 88], sizes = [8, 8], strides = [1, 1]} : vector<8x96xf32> to vector<8x8xf32>
    %c3_50 = arith.constant 3 : index
    %c0_51 = arith.constant 0 : index
    %c0_52 = arith.constant 0 : index
    %63 = vector.load %arg11[%c3_50, %c0_51, %c0_52] : memref<4x8x8xf32, #tpu.memory_space<vmem>>, vector<1x8x8xf32>
    %64 = vector.shape_cast %63 : vector<1x8x8xf32> to vector<8x8xf32>
    %65 = vector.shape_cast %62 : vector<8x8xf32> to vector<1x8x8xf32>
    tpu.vector_store %arg11[%c3_50, %c0_51, %c0_52], %65 {strides = array<i32>} : memref<4x8x8xf32, #tpu.memory_space<vmem>>, vector<1x8x8xf32>,
    %c0_i32 = arith.constant 0 : i32
    %c4_i32 = arith.constant 4 : i32
    %66 = arith.addi %c0_i32, %c4_i32 : i32
    %c1_i32 = arith.constant 1 : i32
    scf.for %arg13 = %c0_i32 to %66 step %c1_i32  : i32 {
      %c1_i32_103 = arith.constant 1 : i32
      %173 = arith.muli %arg13, %c1_i32_103 : i32
      %c0_i32_104 = arith.constant 0 : i32
      %174 = arith.addi %c0_i32_104, %173 : i32
      %175 = arith.index_cast %174 : i32 to index
      %c0_105 = arith.constant 0 : index
      %c0_106 = arith.constant 0 : index
      %176 = vector.load %arg9[%175, %c0_105, %c0_106] : memref<4x8x8xf32, #tpu.memory_space<vmem>>, vector<1x8x8xf32>
      %177 = vector.shape_cast %176 : vector<1x8x8xf32> to vector<8x8xf32>
      %178 = arith.index_cast %174 : i32 to index
      %c0_107 = arith.constant 0 : index
      %c0_108 = arith.constant 0 : index
      %179 = vector.load %arg10[%178, %c0_107, %c0_108] : memref<4x8x8xf32, #tpu.memory_space<vmem>>, vector<1x8x8xf32>
      %180 = vector.shape_cast %179 : vector<1x8x8xf32> to vector<8x8xf32>
      %cst_109 = arith.constant dense<0.000000e+00> : vector<8x8xf32>
      %181 = tpu.matmul %177, %180, %cst_109 {dimension_numbers = #tpu.dot_dimension_numbers<[1], [1], [0], [0], [0, 0, 1, 0], [], []>} : vector<8x8xf32>, vector<8x8xf32>, vector<8x8xf32> -> vector<8x8xf32>
      %182 = arith.addf %181, %5 : vector<8x8xf32>
      %cst_110 = arith.constant dense<0xFF800000> : vector<8xf32>
      %183 = vector.multi_reduction <maximumf>, %182, %cst_110 [1] : vector<8x8xf32> to vector<8xf32>
      %184 = vector.shape_cast %183 : vector<8xf32> to vector<8x1xf32>
      %185 = vector.broadcast %184 : vector<8x1xf32> to vector<8x8xf32>
      %186 = arith.subf %182, %185 : vector<8x8xf32>
      %187 = math.exp %186 : vector<8x8xf32>
      %cst_111 = arith.constant dense<0.000000e+00> : vector<8xf32>
      %188 = vector.multi_reduction <add>, %187, %cst_111 [1] : vector<8x8xf32> to vector<8xf32>
      %189 = vector.shape_cast %188 : vector<8xf32> to vector<8x1xf32>
      %190 = tpu.reciprocal %189 : vector<8x1xf32> -> vector<8x1xf32>
      %191 = vector.broadcast %190 : vector<8x1xf32> to vector<8x8xf32>
      %192 = arith.mulf %187, %191 : vector<8x8xf32>
      %193 = arith.index_cast %174 : i32 to index
      %c0_112 = arith.constant 0 : index
      %c0_113 = arith.constant 0 : index
      %194 = vector.load %arg11[%193, %c0_112, %c0_113] : memref<4x8x8xf32, #tpu.memory_space<vmem>>, vector<1x8x8xf32>
      %195 = vector.shape_cast %194 : vector<1x8x8xf32> to vector<8x8xf32>
      %cst_114 = arith.constant dense<0.000000e+00> : vector<8x8xf32>
      %196 = tpu.matmul %192, %195, %cst_114 {dimension_numbers = #tpu.dot_dimension_numbers<[1], [0], [0], [1], [0, 0, 1, 1], [], []>} : vector<8x8xf32>, vector<8x8xf32>, vector<8x8xf32> -> vector<8x8xf32>
      %197 = arith.index_cast %174 : i32 to index
      %c0_115 = arith.constant 0 : index
      %c0_116 = arith.constant 0 : index
      %198 = vector.load %arg12[%197, %c0_115, %c0_116] : memref<4x8x8xf32, #tpu.memory_space<vmem>>, vector<1x8x8xf32>
      %199 = vector.shape_cast %198 : vector<1x8x8xf32> to vector<8x8xf32>
      %200 = vector.shape_cast %196 : vector<8x8xf32> to vector<1x8x8xf32>
      tpu.vector_store %arg12[%197, %c0_115, %c0_116], %200 {strides = array<i32>} : memref<4x8x8xf32, #tpu.memory_space<vmem>>, vector<1x8x8xf32>,
    }
    %c4_i32_53 = arith.constant 4 : i32
    %c0_54 = arith.constant 0 : index
    %c0_55 = arith.constant 0 : index
    %c0_56 = arith.constant 0 : index
    %67 = vector.load %arg12[%c0_54, %c0_55, %c0_56] : memref<4x8x8xf32, #tpu.memory_space<vmem>>, vector<1x8x8xf32>
    %68 = vector.shape_cast %67 : vector<1x8x8xf32> to vector<8x8xf32>
    %c1_57 = arith.constant 1 : index
    %c0_58 = arith.constant 0 : index
    %c0_59 = arith.constant 0 : index
    %69 = vector.load %arg12[%c1_57, %c0_58, %c0_59] : memref<4x8x8xf32, #tpu.memory_space<vmem>>, vector<1x8x8xf32>
    %70 = vector.shape_cast %69 : vector<1x8x8xf32> to vector<8x8xf32>
    %c2_60 = arith.constant 2 : index
    %c0_61 = arith.constant 0 : index
    %c0_62 = arith.constant 0 : index
    %71 = vector.load %arg12[%c2_60, %c0_61, %c0_62] : memref<4x8x8xf32, #tpu.memory_space<vmem>>, vector<1x8x8xf32>
    %72 = vector.shape_cast %71 : vector<1x8x8xf32> to vector<8x8xf32>
    %c3_63 = arith.constant 3 : index
    %c0_64 = arith.constant 0 : index
    %c0_65 = arith.constant 0 : index
    %73 = vector.load %arg12[%c3_63, %c0_64, %c0_65] : memref<4x8x8xf32, #tpu.memory_space<vmem>>, vector<1x8x8xf32>
    %74 = vector.shape_cast %73 : vector<1x8x8xf32> to vector<8x8xf32>
    %75 = tpu.concatenate %68, %70, %72, %74 in 1 : vector<8x8xf32>, vector<8x8xf32>, vector<8x8xf32>, vector<8x8xf32> -> vector<8x32xf32>
    %c0_66 = arith.constant 0 : index
    %c0_67 = arith.constant 0 : index
    %76 = vector.load %arg4[%c0_66, %c0_67] : memref<32x32xf32, #tpu.memory_space<vmem>>, vector<32x32xf32>
    %cst_68 = arith.constant dense<0.000000e+00> : vector<8x32xf32>
    %77 = tpu.matmul %75, %76, %cst_68 {dimension_numbers = #tpu.dot_dimension_numbers<[1], [0], [0], [1], [0, 0, 1, 1], [], []>} : vector<8x32xf32>, vector<32x32xf32>, vector<8x32xf32> -> vector<8x32xf32>
    %78 = vector.broadcast %7 : vector<1x32xf32> to vector<8x32xf32>
    %79 = arith.addf %77, %78 : vector<8x32xf32>
    %80 = arith.addf %79, %1 : vector<8x32xf32>
    %cst_69 = arith.constant dense<0.000000e+00> : vector<8xf32>
    %81 = vector.multi_reduction <add>, %80, %cst_69 [1] : vector<8x32xf32> to vector<8xf32>
    %82 = vector.shape_cast %81 : vector<8xf32> to vector<8x1xf32>
    %cst_70 = arith.constant 3.200000e+01 : f32
    %83 = vector.broadcast %cst_70 : f32 to vector<8x1xf32>
    %84 = arith.divf %82, %83 : vector<8x1xf32>
    %85 = vector.broadcast %84 : vector<8x1xf32> to vector<8x32xf32>
    %86 = arith.subf %80, %85 : vector<8x32xf32>
    %87 = arith.mulf %86, %86 : vector<8x32xf32>
    %cst_71 = arith.constant dense<0.000000e+00> : vector<8xf32>
    %88 = vector.multi_reduction <add>, %87, %cst_71 [1] : vector<8x32xf32> to vector<8xf32>
    %89 = vector.shape_cast %88 : vector<8xf32> to vector<8x1xf32>
    %cst_72 = arith.constant 3.200000e+01 : f32
    %90 = vector.broadcast %cst_72 : f32 to vector<8x1xf32>
    %91 = arith.divf %89, %90 : vector<8x1xf32>
    %cst_73 = arith.constant 9.99999996E-13 : f32
    %92 = vector.broadcast %cst_73 : f32 to vector<8x1xf32>
    %93 = arith.addf %91, %92 : vector<8x1xf32>
    %94 = math.rsqrt %93 : vector<8x1xf32>
    %95 = vector.broadcast %94 : vector<8x1xf32> to vector<8x32xf32>
    %96 = arith.mulf %86, %95 : vector<8x32xf32>
    %97 = vector.broadcast %8 : vector<1x32xf32> to vector<8x32xf32>
    %98 = arith.mulf %96, %97 : vector<8x32xf32>
    %99 = vector.broadcast %9 : vector<1x32xf32> to vector<8x32xf32>
    %100 = arith.addf %98, %99 : vector<8x32xf32>
    %c0_74 = arith.constant 0 : index
    %c0_75 = arith.constant 0 : index
    %101 = vector.load %arg5[%c0_74, %c0_75] : memref<32x128xf32, #tpu.memory_space<vmem>>, vector<32x128xf32>
    %cst_76 = arith.constant dense<0.000000e+00> : vector<8x128xf32>
    %102 = tpu.matmul %100, %101, %cst_76 {dimension_numbers = #tpu.dot_dimension_numbers<[1], [0], [0], [1], [0, 0, 1, 1], [], []>} : vector<8x32xf32>, vector<32x128xf32>, vector<8x128xf32> -> vector<8x128xf32>
    %103 = vector.broadcast %10 : vector<1x128xf32> to vector<8x128xf32>
    %104 = arith.addf %102, %103 : vector<8x128xf32>
    %cst_77 = arith.constant 5.000000e-01 : f32
    %105 = vector.broadcast %cst_77 : f32 to vector<8x128xf32>
    %106 = arith.mulf %104, %105 : vector<8x128xf32>
    %cst_78 = arith.constant 0.707106769 : f32
    %107 = vector.broadcast %cst_78 : f32 to vector<8x128xf32>
    %108 = arith.mulf %104, %107 : vector<8x128xf32>
    %cst_79 = arith.constant 0.000000e+00 : f32
    %109 = vector.broadcast %cst_79 : f32 to vector<8x128xf32>
    %110 = arith.cmpf oge, %108, %109 : vector<8x128xf32>
    %cst_80 = arith.constant 1.000000e+00 : f32
    %cst_81 = arith.constant -1.000000e+00 : f32
    %111 = vector.broadcast %cst_80 : f32 to vector<8x128xf32>
    %112 = vector.broadcast %cst_81 : f32 to vector<8x128xf32>
    %113 = arith.select %110, %111, %112 : vector<8x128xi1>, vector<8x128xf32>
    %114 = math.absf %108 : vector<8x128xf32>
    %cst_82 = arith.constant 0.327591091 : f32
    %115 = vector.broadcast %cst_82 : f32 to vector<8x128xf32>
    %116 = arith.mulf %115, %114 : vector<8x128xf32>
    %cst_83 = arith.constant 1.000000e+00 : f32
    %117 = vector.broadcast %cst_83 : f32 to vector<8x128xf32>
    %118 = arith.addf %117, %116 : vector<8x128xf32>
    %119 = tpu.reciprocal %118 : vector<8x128xf32> -> vector<8x128xf32>
    %cst_84 = arith.constant 1.06140542 : f32
    %120 = vector.broadcast %cst_84 : f32 to vector<8x128xf32>
    %121 = arith.mulf %120, %119 : vector<8x128xf32>
    %cst_85 = arith.constant -1.45315206 : f32
    %122 = vector.broadcast %cst_85 : f32 to vector<8x128xf32>
    %123 = arith.addf %121, %122 : vector<8x128xf32>
    %124 = arith.mulf %123, %119 : vector<8x128xf32>
    %cst_86 = arith.constant 1.42141378 : f32
    %125 = vector.broadcast %cst_86 : f32 to vector<8x128xf32>
    %126 = arith.addf %124, %125 : vector<8x128xf32>
    %127 = arith.mulf %126, %119 : vector<8x128xf32>
    %cst_87 = arith.constant -0.284496725 : f32
    %128 = vector.broadcast %cst_87 : f32 to vector<8x128xf32>
    %129 = arith.addf %127, %128 : vector<8x128xf32>
    %130 = arith.mulf %129, %119 : vector<8x128xf32>
    %cst_88 = arith.constant 0.254829586 : f32
    %131 = vector.broadcast %cst_88 : f32 to vector<8x128xf32>
    %132 = arith.addf %130, %131 : vector<8x128xf32>
    %133 = arith.mulf %132, %119 : vector<8x128xf32>
    %cst_89 = arith.constant 0.000000e+00 : f32
    %134 = vector.broadcast %cst_89 : f32 to vector<8x128xf32>
    %135 = arith.subf %134, %114 : vector<8x128xf32>
    %136 = arith.mulf %135, %114 : vector<8x128xf32>
    %137 = math.exp %136 : vector<8x128xf32>
    %138 = arith.mulf %133, %137 : vector<8x128xf32>
    %cst_90 = arith.constant 1.000000e+00 : f32
    %139 = vector.broadcast %cst_90 : f32 to vector<8x128xf32>
    %140 = arith.subf %139, %138 : vector<8x128xf32>
    %141 = arith.mulf %113, %140 : vector<8x128xf32>
    %cst_91 = arith.constant 1.000000e+00 : f32
    %142 = vector.broadcast %cst_91 : f32 to vector<8x128xf32>
    %143 = arith.addf %142, %141 : vector<8x128xf32>
    %144 = arith.mulf %106, %143 : vector<8x128xf32>
    %c0_92 = arith.constant 0 : index
    %c0_93 = arith.constant 0 : index
    %145 = vector.load %arg6[%c0_92, %c0_93] : memref<128x32xf32, #tpu.memory_space<vmem>>, vector<128x32xf32>
    %cst_94 = arith.constant dense<0.000000e+00> : vector<8x32xf32>
    %146 = tpu.matmul %144, %145, %cst_94 {dimension_numbers = #tpu.dot_dimension_numbers<[1], [0], [0], [1], [0, 0, 1, 1], [], []>} : vector<8x128xf32>, vector<128x32xf32>, vector<8x32xf32> -> vector<8x32xf32>
    %147 = vector.broadcast %11 : vector<1x32xf32> to vector<8x32xf32>
    %148 = arith.addf %146, %147 : vector<8x32xf32>
    %149 = arith.addf %148, %100 : vector<8x32xf32>
    %cst_95 = arith.constant dense<0.000000e+00> : vector<8xf32>
    %150 = vector.multi_reduction <add>, %149, %cst_95 [1] : vector<8x32xf32> to vector<8xf32>
    %151 = vector.shape_cast %150 : vector<8xf32> to vector<8x1xf32>
    %cst_96 = arith.constant 3.200000e+01 : f32
    %152 = vector.broadcast %cst_96 : f32 to vector<8x1xf32>
    %153 = arith.divf %151, %152 : vector<8x1xf32>
    %154 = vector.broadcast %153 : vector<8x1xf32> to vector<8x32xf32>
    %155 = arith.subf %149, %154 : vector<8x32xf32>
    %156 = arith.mulf %155, %155 : vector<8x32xf32>
    %cst_97 = arith.constant dense<0.000000e+00> : vector<8xf32>
    %157 = vector.multi_reduction <add>, %156, %cst_97 [1] : vector<8x32xf32> to vector<8xf32>
    %158 = vector.shape_cast %157 : vector<8xf32> to vector<8x1xf32>
    %cst_98 = arith.constant 3.200000e+01 : f32
    %159 = vector.broadcast %cst_98 : f32 to vector<8x1xf32>
    %160 = arith.divf %158, %159 : vector<8x1xf32>
    %cst_99 = arith.constant 9.99999996E-13 : f32
    %161 = vector.broadcast %cst_99 : f32 to vector<8x1xf32>
    %162 = arith.addf %160, %161 : vector<8x1xf32>
    %163 = math.rsqrt %162 : vector<8x1xf32>
    %164 = vector.broadcast %163 : vector<8x1xf32> to vector<8x32xf32>
    %165 = arith.mulf %155, %164 : vector<8x32xf32>
    %166 = vector.broadcast %12 : vector<1x32xf32> to vector<8x32xf32>
    %167 = arith.mulf %165, %166 : vector<8x32xf32>
    %168 = vector.broadcast %13 : vector<1x32xf32> to vector<8x32xf32>
    %169 = arith.addf %167, %168 : vector<8x32xf32>
    %c0_100 = arith.constant 0 : index
    %c0_101 = arith.constant 0 : index
    %c0_102 = arith.constant 0 : index
    %170 = vector.load %arg8[%c0_100, %c0_101, %c0_102] : memref<1x8x32xf32, #tpu.memory_space<vmem>>, vector<1x8x32xf32>
    %171 = vector.shape_cast %170 : vector<1x8x32xf32> to vector<8x32xf32>
    %172 = vector.shape_cast %169 : vector<8x32xf32> to vector<1x8x32xf32>
    tpu.vector_store %arg8[%c0_100, %c0_101, %c0_102], %172 {strides = array<i32>} : memref<1x8x32xf32, #tpu.memory_space<vmem>>, vector<1x8x32xf32>,
    return
  }
  func.func @transform_0(%arg0: i32) -> (i32, i32, i32) {
    %c0_i32 = arith.constant 0 : i32
    %c0_i32_0 = arith.constant 0 : i32
    %c0_i32_1 = arith.constant 0 : i32
    return %arg0, %c0_i32, %c0_i32_0 : i32, i32, i32
  }
  func.func @transform_1(%arg0: i32) -> (i32, i32, i32, i32) {
    %c0_i32 = arith.constant 0 : i32
    %c0_i32_0 = arith.constant 0 : i32
    %c0_i32_1 = arith.constant 0 : i32
    %c0_i32_2 = arith.constant 0 : i32
    return %arg0, %c0_i32, %c0_i32_0, %c0_i32_1 : i32, i32, i32, i32
  }
  func.func @transform_2(%arg0: i32) -> (i32, i32) {
    %c0_i32 = arith.constant 0 : i32
    %c0_i32_0 = arith.constant 0 : i32
    %c0_i32_1 = arith.constant 0 : i32
    return %c0_i32, %c0_i32_0 : i32, i32
  }
  func.func @transform_3(%arg0: i32) -> (i32, i32) {
    %c0_i32 = arith.constant 0 : i32
    %c0_i32_0 = arith.constant 0 : i32
    %c0_i32_1 = arith.constant 0 : i32
    return %c0_i32, %c0_i32_0 : i32, i32
  }
  func.func @transform_4(%arg0: i32) -> (i32, i32) {
    %c0_i32 = arith.constant 0 : i32
    %c0_i32_0 = arith.constant 0 : i32
    %c0_i32_1 = arith.constant 0 : i32
    return %c0_i32, %c0_i32_0 : i32, i32
  }
  func.func @transform_5(%arg0: i32) -> (i32, i32) {
    %c0_i32 = arith.constant 0 : i32
    %c0_i32_0 = arith.constant 0 : i32
    %c0_i32_1 = arith.constant 0 : i32
    return %c0_i32, %c0_i32_0 : i32, i32
  }
  func.func @transform_6(%arg0: i32) -> (i32, i32) {
    %c0_i32 = arith.constant 0 : i32
    %c0_i32_0 = arith.constant 0 : i32
    %c0_i32_1 = arith.constant 0 : i32
    return %c0_i32, %c0_i32_0 : i32, i32
  }
  func.func @transform_7(%arg0: i32) -> (i32, i32, i32) {
    %c0_i32 = arith.constant 0 : i32
    %c0_i32_0 = arith.constant 0 : i32
    %c0_i32_1 = arith.constant 0 : i32
    return %arg0, %c0_i32, %c0_i32_0 : i32, i32, i32
  }
}

module attributes {stable_mosaic.version = 11 : i64} {
  func.func @_bert_layer_kernel(%arg0: i32, %arg1: memref<1x8x32xf32, #tpu.memory_space<vmem>>, %arg2: memref<1x1x1x8xf32, #tpu.memory_space<vmem>>, %arg3: memref<32x96xf32, #tpu.memory_space<vmem>>, %arg4: memref<32x32xf32, #tpu.memory_space<vmem>>, %arg5: memref<32x128xf32, #tpu.memory_space<vmem>>, %arg6: memref<128x32xf32, #tpu.memory_space<vmem>>, %arg7: memref<8x128xf32, #tpu.memory_space<vmem>>, %arg8: memref<1x8x32xf32, #tpu.memory_space<vmem>>, %arg9: memref<4x8x8xf32, #tpu.memory_space<vmem>>, %arg10: memref<4x8x8xf32, #tpu.memory_space<vmem>>, %arg11: memref<4x8x8xf32, #tpu.memory_space<vmem>>, %arg12: memref<4x8x8xf32, #tpu.memory_space<vmem>>) attributes {dimension_semantics = [#tpu.dimension_semantics<parallel>], iteration_bounds = array<i64: 2>, scalar_prefetch = 0 : i64, scratch_operands = 4 : i64, tpu.core_type = #tpu.core_type<tc>, window_params = [{transform_indices = @transform_0, window_bounds = array<i64: 1, 8, 32>}, {transform_indices = @transform_1, window_bounds = array<i64: 1, 1, 1, 8>}, {pipeline_mode = #tpu.pipeline_mode<synchronous>, transform_indices = @transform_2, window_bounds = array<i64: 32, 96>}, {pipeline_mode = #tpu.pipeline_mode<synchronous>, transform_indices = @transform_3, window_bounds = array<i64: 32, 32>}, {pipeline_mode = #tpu.pipeline_mode<synchronous>, transform_indices = @transform_4, window_bounds = array<i64: 32, 128>}, {pipeline_mode = #tpu.pipeline_mode<synchronous>, transform_indices = @transform_5, window_bounds = array<i64: 128, 32>}, {pipeline_mode = #tpu.pipeline_mode<synchronous>, transform_indices = @transform_6, window_bounds = array<i64: 8, 128>}, {transform_indices = @transform_7, window_bounds = array<i64: 1, 8, 32>}]} {
    %c0 = arith.constant 0 : index
    %c0_0 = arith.constant 0 : index
    %c0_1 = arith.constant 0 : index
    %0 = vector.load %arg1[%c0, %c0_0, %c0_1] : memref<1x8x32xf32, #tpu.memory_space<vmem>>, vector<1x8x32xf32>
    %1 = vector.shape_cast %0 : vector<1x8x32xf32> to vector<8x32xf32>
    %c0_2 = arith.constant 0 : index
    %c0_3 = arith.constant 0 : index
    %c0_4 = arith.constant 0 : index
    %c0_5 = arith.constant 0 : index
    %2 = vector.load %arg2[%c0_2, %c0_3, %c0_4, %c0_5] : memref<1x1x1x8xf32, #tpu.memory_space<vmem>>, vector<1x1x1x8xf32>
    %3 = vector.shape_cast %2 : vector<1x1x1x8xf32> to vector<1x8xf32>
    %4 = vector.shape_cast %3 : vector<1x8xf32> to vector<1x8xf32>
    %5 = vector.broadcast %4 : vector<1x8xf32> to vector<8x8xf32>
    %c0_6 = arith.constant 0 : index
    %c0_7 = arith.constant 0 : index
    %6 = vector.load %arg7[%c0_6, %c0_7] : memref<8x128xf32, #tpu.memory_space<vmem>>, vector<1x96xf32>
    %c1 = arith.constant 1 : index
    %c0_8 = arith.constant 0 : index
    %7 = vector.load %arg7[%c1, %c0_8] : memref<8x128xf32, #tpu.memory_space<vmem>>, vector<1x32xf32>
    %c2 = arith.constant 2 : index
    %c0_9 = arith.constant 0 : index
    %8 = vector.load %arg7[%c2, %c0_9] : memref<8x128xf32, #tpu.memory_space<vmem>>, vector<1x32xf32>
    %c3 = arith.constant 3 : index
    %c0_10 = arith.constant 0 : index
    %9 = vector.load %arg7[%c3, %c0_10] : memref<8x128xf32, #tpu.memory_space<vmem>>, vector<1x32xf32>
    %c4 = arith.constant 4 : index
    %c0_11 = arith.constant 0 : index
    %10 = vector.load %arg7[%c4, %c0_11] : memref<8x128xf32, #tpu.memory_space<vmem>>, vector<1x128xf32>
    %c5 = arith.constant 5 : index
    %c0_12 = arith.constant 0 : index
    %11 = vector.load %arg7[%c5, %c0_12] : memref<8x128xf32, #tpu.memory_space<vmem>>, vector<1x32xf32>
    %c6 = arith.constant 6 : index
    %c0_13 = arith.constant 0 : index
    %12 = vector.load %arg7[%c6, %c0_13] : memref<8x128xf32, #tpu.memory_space<vmem>>, vector<1x32xf32>
    %c7 = arith.constant 7 : index
    %c0_14 = arith.constant 0 : index
    %13 = vector.load %arg7[%c7, %c0_14] : memref<8x128xf32, #tpu.memory_space<vmem>>, vector<1x32xf32>
    %c0_15 = arith.constant 0 : index
    %c0_16 = arith.constant 0 : index
    %14 = vector.load %arg3[%c0_15, %c0_16] : memref<32x96xf32, #tpu.memory_space<vmem>>, vector<32x96xf32>
    %cst = arith.constant dense<0.000000e+00> : vector<8x96xf32>
    %15 = tpu.matmul %1, %14, %cst {dimension_numbers = #tpu.dot_dimension_numbers<[1], [0], [0], [1], [0, 0, 1, 1], [], []>} : vector<8x32xf32>, vector<32x96xf32>, vector<8x96xf32> -> vector<8x96xf32>
    %16 = vector.broadcast %6 : vector<1x96xf32> to vector<8x96xf32>
    %17 = arith.addf %15, %16 : vector<8x96xf32>
    %18 = vector.extract_strided_slice %17 {offsets = [0, 0], sizes = [8, 8], strides = [1, 1]} : vector<8x96xf32> to vector<8x8xf32>
    %c0_17 = arith.constant 0 : index
    %c0_18 = arith.constant 0 : index
    %c0_19 = arith.constant 0 : index
    %19 = vector.load %arg9[%c0_17, %c0_18, %c0_19] : memref<4x8x8xf32, #tpu.memory_space<vmem>>, vector<1x8x8xf32>
    %20 = vector.shape_cast %19 : vector<1x8x8xf32> to vector<8x8xf32>
    %21 = vector.shape_cast %18 : vector<8x8xf32> to vector<1x8x8xf32>
    tpu.vector_store %arg9[%c0_17, %c0_18, %c0_19], %21 {strides = array<i32>} : memref<4x8x8xf32, #tpu.memory_space<vmem>>, vector<1x8x8xf32>,
    %22 = vector.extract_strided_slice %17 {offsets = [0, 32], sizes = [8, 8], strides = [1, 1]} : vector<8x96xf32> to vector<8x8xf32>
    %c0_20 = arith.constant 0 : index
    %c0_21 = arith.constant 0 : index
    %c0_22 = arith.constant 0 : index
    %23 = vector.load %arg10[%c0_20, %c0_21, %c0_22] : memref<4x8x8xf32, #tpu.memory_space<vmem>>, vector<1x8x8xf32>
    %24 = vector.shape_cast %23 : vector<1x8x8xf32> to vector<8x8xf32>
    %25 = vector.shape_cast %22 : vector<8x8xf32> to vector<1x8x8xf32>
    tpu.vector_store %arg10[%c0_20, %c0_21, %c0_22], %25 {strides = array<i32>} : memref<4x8x8xf32, #tpu.memory_space<vmem>>, vector<1x8x8xf32>,
    %26 = vector.extract_strided_slice %17 {offsets = [0, 64], sizes = [8, 8], strides = [1, 1]} : vector<8x96xf32> to vector<8x8xf32>
    %c0_23 = arith.constant 0 : index
    %c0_24 = arith.constant 0 : index
    %c0_25 = arith.constant 0 : index
    %27 = vector.load %arg11[%c0_23, %c0_24, %c0_25] : memref<4x8x8xf32, #tpu.memory_space<vmem>>, vector<1x8x8xf32>
    %28 = vector.shape_cast %27 : vector<1x8x8xf32> to vector<8x8xf32>
    %29 = vector.shape_cast %26 : vector<8x8xf32> to vector<1x8x8xf32>
    tpu.vector_store %arg11[%c0_23, %c0_24, %c0_25], %29 {strides = array<i32>} : memref<4x8x8xf32, #tpu.memory_space<vmem>>, vector<1x8x8xf32>,
    %30 = vector.extract_strided_slice %17 {offsets = [0, 8], sizes = [8, 8], strides = [1, 1]} : vector<8x96xf32> to vector<8x8xf32>
    %c1_26 = arith.constant 1 : index
    %c0_27 = arith.constant 0 : index
    %c0_28 = arith.constant 0 : index
    %31 = vector.load %arg9[%c1_26, %c0_27, %c0_28] : memref<4x8x8xf32, #tpu.memory_space<vmem>>, vector<1x8x8xf32>
    %32 = vector.shape_cast %31 : vector<1x8x8xf32> to vector<8x8xf32>
    %33 = vector.shape_cast %30 : vector<8x8xf32> to vector<1x8x8xf32>
    tpu.vector_store %arg9[%c1_26, %c0_27, %c0_28], %33 {strides = array<i32>} : memref<4x8x8xf32, #tpu.memory_space<vmem>>, vector<1x8x8xf32>,
    %34 = vector.extract_strided_slice %17 {offsets = [0, 40], sizes = [8, 8], strides = [1, 1]} : vector<8x96xf32> to vector<8x8xf32>
    %c1_29 = arith.constant 1 : index
    %c0_30 = arith.constant 0 : index
    %c0_31 = arith.constant 0 : index
    %35 = vector.load %arg10[%c1_29, %c0_30, %c0_31] : memref<4x8x8xf32, #tpu.memory_space<vmem>>, vector<1x8x8xf32>
    %36 = vector.shape_cast %35 : vector<1x8x8xf32> to vector<8x8xf32>
    %37 = vector.shape_cast %34 : vector<8x8xf32> to vector<1x8x8xf32>
    tpu.vector_store %arg10[%c1_29, %c0_30, %c0_31], %37 {strides = array<i32>} : memref<4x8x8xf32, #tpu.memory_space<vmem>>, vector<1x8x8xf32>,
    %38 = vector.extract_strided_slice %17 {offsets = [0, 72], sizes = [8, 8], strides = [1, 1]} : vector<8x96xf32> to vector<8x8xf32>
    %c1_32 = arith.constant 1 : index
    %c0_33 = arith.constant 0 : index
    %c0_34 = arith.constant 0 : index
    %39 = vector.load %arg11[%c1_32, %c0_33, %c0_34] : memref<4x8x8xf32, #tpu.memory_space<vmem>>, vector<1x8x8xf32>
    %40 = vector.shape_cast %39 : vector<1x8x8xf32> to vector<8x8xf32>
    %41 = vector.shape_cast %38 : vector<8x8xf32> to vector<1x8x8xf32>
    tpu.vector_store %arg11[%c1_32, %c0_33, %c0_34], %41 {strides = array<i32>} : memref<4x8x8xf32, #tpu.memory_space<vmem>>, vector<1x8x8xf32>,
    %42 = vector.extract_strided_slice %17 {offsets = [0, 16], sizes = [8, 8], strides = [1, 1]} : vector<8x96xf32> to vector<8x8xf32>
    %c2_35 = arith.constant 2 : index
    %c0_36 = arith.constant 0 : index
    %c0_37 = arith.constant 0 : index
    %43 = vector.load %arg9[%c2_35, %c0_36, %c0_37] : memref<4x8x8xf32, #tpu.memory_space<vmem>>, vector<1x8x8xf32>
    %44 = vector.shape_cast %43 : vector<1x8x8xf32> to vector<8x8xf32>
    %45 = vector.shape_cast %42 : vector<8x8xf32> to vector<1x8x8xf32>
    tpu.vector_store %arg9[%c2_35, %c0_36, %c0_37], %45 {strides = array<i32>} : memref<4x8x8xf32, #tpu.memory_space<vmem>>, vector<1x8x8xf32>,
    %46 = vector.extract_strided_slice %17 {offsets = [0, 48], sizes = [8, 8], strides = [1, 1]} : vector<8x96xf32> to vector<8x8xf32>
    %c2_38 = arith.constant 2 : index
    %c0_39 = arith.constant 0 : index
    %c0_40 = arith.constant 0 : index
    %47 = vector.load %arg10[%c2_38, %c0_39, %c0_40] : memref<4x8x8xf32, #tpu.memory_space<vmem>>, vector<1x8x8xf32>
    %48 = vector.shape_cast %47 : vector<1x8x8xf32> to vector<8x8xf32>
    %49 = vector.shape_cast %46 : vector<8x8xf32> to vector<1x8x8xf32>
    tpu.vector_store %arg10[%c2_38, %c0_39, %c0_40], %49 {strides = array<i32>} : memref<4x8x8xf32, #tpu.memory_space<vmem>>, vector<1x8x8xf32>,
    %50 = vector.extract_strided_slice %17 {offsets = [0, 80], sizes = [8, 8], strides = [1, 1]} : vector<8x96xf32> to vector<8x8xf32>
    %c2_41 = arith.constant 2 : index
    %c0_42 = arith.constant 0 : index
    %c0_43 = arith.constant 0 : index
    %51 = vector.load %arg11[%c2_41, %c0_42, %c0_43] : memref<4x8x8xf32, #tpu.memory_space<vmem>>, vector<1x8x8xf32>
    %52 = vector.shape_cast %51 : vector<1x8x8xf32> to vector<8x8xf32>
    %53 = vector.shape_cast %50 : vector<8x8xf32> to vector<1x8x8xf32>
    tpu.vector_store %arg11[%c2_41, %c0_42, %c0_43], %53 {strides = array<i32>} : memref<4x8x8xf32, #tpu.memory_space<vmem>>, vector<1x8x8xf32>,
    %54 = vector.extract_strided_slice %17 {offsets = [0, 24], sizes = [8, 8], strides = [1, 1]} : vector<8x96xf32> to vector<8x8xf32>
    %c3_44 = arith.constant 3 : index
    %c0_45 = arith.constant 0 : index
    %c0_46 = arith.constant 0 : index
    %55 = vector.load %arg9[%c3_44, %c0_45, %c0_46] : memref<4x8x8xf32, #tpu.memory_space<vmem>>, vector<1x8x8xf32>
    %56 = vector.shape_cast %55 : vector<1x8x8xf32> to vector<8x8xf32>
    %57 = vector.shape_cast %54 : vector<8x8xf32> to vector<1x8x8xf32>
    tpu.vector_store %arg9[%c3_44, %c0_45, %c0_46], %57 {strides = array<i32>} : memref<4x8x8xf32, #tpu.memory_space<vmem>>, vector<1x8x8xf32>,
    %58 = vector.extract_strided_slice %17 {offsets = [0, 56], sizes = [8, 8], strides = [1, 1]} : vector<8x96xf32> to vector<8x8xf32>
    %c3_47 = arith.constant 3 : index
    %c0_48 = arith.constant 0 : index
    %c0_49 = arith.constant 0 : index
    %59 = vector.load %arg10[%c3_47, %c0_48, %c0_49] : memref<4x8x8xf32, #tpu.memory_space<vmem>>, vector<1x8x8xf32>
    %60 = vector.shape_cast %59 : vector<1x8x8xf32> to vector<8x8xf32>
    %61 = vector.shape_cast %58 : vector<8x8xf32> to vector<1x8x8xf32>
    tpu.vector_store %arg10[%c3_47, %c0_48, %c0_49], %61 {strides = array<i32>} : memref<4x8x8xf32, #tpu.memory_space<vmem>>, vector<1x8x8xf32>,
    %62 = vector.extract_strided_slice %17 {offsets = [0, 88], sizes = [8, 8], strides = [1, 1]} : vector<8x96xf32> to vector<8x8xf32>
    %c3_50 = arith.constant 3 : index
    %c0_51 = arith.constant 0 : index
    %c0_52 = arith.constant 0 : index
    %63 = vector.load %arg11[%c3_50, %c0_51, %c0_52] : memref<4x8x8xf32, #tpu.memory_space<vmem>>, vector<1x8x8xf32>
    %64 = vector.shape_cast %63 : vector<1x8x8xf32> to vector<8x8xf32>
    %65 = vector.shape_cast %62 : vector<8x8xf32> to vector<1x8x8xf32>
    tpu.vector_store %arg11[%c3_50, %c0_51, %c0_52], %65 {strides = array<i32>} : memref<4x8x8xf32, #tpu.memory_space<vmem>>, vector<1x8x8xf32>,
    %c0_i32 = arith.constant 0 : i32
    %c4_i32 = arith.constant 4 : i32
    %66 = arith.addi %c0_i32, %c4_i32 : i32
    %c1_i32 = arith.constant 1 : i32
    scf.for %arg13 = %c0_i32 to %66 step %c1_i32  : i32 {
      %c1_i32_103 = arith.constant 1 : i32
      %173 = arith.muli %arg13, %c1_i32_103 : i32
      %c0_i32_104 = arith.constant 0 : i32
      %174 = arith.addi %c0_i32_104, %173 : i32
      %175 = arith.index_cast %174 : i32 to index
      %c0_105 = arith.constant 0 : index
      %c0_106 = arith.constant 0 : index
      %176 = vector.load %arg9[%175, %c0_105, %c0_106] : memref<4x8x8xf32, #tpu.memory_space<vmem>>, vector<1x8x8xf32>
      %177 = vector.shape_cast %176 : vector<1x8x8xf32> to vector<8x8xf32>
      %178 = arith.index_cast %174 : i32 to index
      %c0_107 = arith.constant 0 : index
      %c0_108 = arith.constant 0 : index
      %179 = vector.load %arg10[%178, %c0_107, %c0_108] : memref<4x8x8xf32, #tpu.memory_space<vmem>>, vector<1x8x8xf32>
      %180 = vector.shape_cast %179 : vector<1x8x8xf32> to vector<8x8xf32>
      %cst_109 = arith.constant dense<0.000000e+00> : vector<8x8xf32>
      %181 = tpu.matmul %177, %180, %cst_109 {dimension_numbers = #tpu.dot_dimension_numbers<[1], [1], [0], [0], [0, 0, 1, 0], [], []>} : vector<8x8xf32>, vector<8x8xf32>, vector<8x8xf32> -> vector<8x8xf32>
      %182 = arith.addf %181, %5 : vector<8x8xf32>
      %cst_110 = arith.constant dense<0xFF800000> : vector<8xf32>
      %183 = vector.multi_reduction <maximumf>, %182, %cst_110 [1] : vector<8x8xf32> to vector<8xf32>
      %184 = vector.shape_cast %183 : vector<8xf32> to vector<8x1xf32>
      %185 = vector.broadcast %184 : vector<8x1xf32> to vector<8x8xf32>
      %186 = arith.subf %182, %185 : vector<8x8xf32>
      %187 = math.exp %186 : vector<8x8xf32>
      %cst_111 = arith.constant dense<0.000000e+00> : vector<8xf32>
      %188 = vector.multi_reduction <add>, %187, %cst_111 [1] : vector<8x8xf32> to vector<8xf32>
      %189 = vector.shape_cast %188 : vector<8xf32> to vector<8x1xf32>
      %190 = tpu.reciprocal %189 : vector<8x1xf32> -> vector<8x1xf32>
      %191 = vector.broadcast %190 : vector<8x1xf32> to vector<8x8xf32>
      %192 = arith.mulf %187, %191 : vector<8x8xf32>
      %193 = arith.index_cast %174 : i32 to index
      %c0_112 = arith.constant 0 : index
      %c0_113 = arith.constant 0 : index
      %194 = vector.load %arg11[%193, %c0_112, %c0_113] : memref<4x8x8xf32, #tpu.memory_space<vmem>>, vector<1x8x8xf32>
      %195 = vector.shape_cast %194 : vector<1x8x8xf32> to vector<8x8xf32>
      %cst_114 = arith.constant dense<0.000000e+00> : vector<8x8xf32>
      %196 = tpu.matmul %192, %195, %cst_114 {dimension_numbers = #tpu.dot_dimension_numbers<[1], [0], [0], [1], [0, 0, 1, 1], [], []>} : vector<8x8xf32>, vector<8x8xf32>, vector<8x8xf32> -> vector<8x8xf32>
      %197 = arith.index_cast %174 : i32 to index
      %c0_115 = arith.constant 0 : index
      %c0_116 = arith.constant 0 : index
      %198 = vector.load %arg12[%197, %c0_115, %c0_116] : memref<4x8x8xf32, #tpu.memory_space<vmem>>, vector<1x8x8xf32>
      %199 = vector.shape_cast %198 : vector<1x8x8xf32> to vector<8x8xf32>
      %200 = vector.shape_cast %196 : vector<8x8xf32> to vector<1x8x8xf32>
      tpu.vector_store %arg12[%197, %c0_115, %c0_116], %200 {strides = array<i32>} : memref<4x8x8xf32, #tpu.memory_space<vmem>>, vector<1x8x8xf32>,
    }
    %c4_i32_53 = arith.constant 4 : i32
    %c0_54 = arith.constant 0 : index
    %c0_55 = arith.constant 0 : index
    %c0_56 = arith.constant 0 : index
    %67 = vector.load %arg12[%c0_54, %c0_55, %c0_56] : memref<4x8x8xf32, #tpu.memory_space<vmem>>, vector<1x8x8xf32>
    %68 = vector.shape_cast %67 : vector<1x8x8xf32> to vector<8x8xf32>
    %c1_57 = arith.constant 1 : index
    %c0_58 = arith.constant 0 : index
    %c0_59 = arith.constant 0 : index
    %69 = vector.load %arg12[%c1_57, %c0_58, %c0_59] : memref<4x8x8xf32, #tpu.memory_space<vmem>>, vector<1x8x8xf32>
    %70 = vector.shape_cast %69 : vector<1x8x8xf32> to vector<8x8xf32>
    %c2_60 = arith.constant 2 : index
    %c0_61 = arith.constant 0 : index
    %c0_62 = arith.constant 0 : index
    %71 = vector.load %arg12[%c2_60, %c0_61, %c0_62] : memref<4x8x8xf32, #tpu.memory_space<vmem>>, vector<1x8x8xf32>
    %72 = vector.shape_cast %71 : vector<1x8x8xf32> to vector<8x8xf32>
    %c3_63 = arith.constant 3 : index
    %c0_64 = arith.constant 0 : index
    %c0_65 = arith.constant 0 : index
    %73 = vector.load %arg12[%c3_63, %c0_64, %c0_65] : memref<4x8x8xf32, #tpu.memory_space<vmem>>, vector<1x8x8xf32>
    %74 = vector.shape_cast %73 : vector<1x8x8xf32> to vector<8x8xf32>
    %75 = tpu.concatenate %68, %70, %72, %74 in 1 : vector<8x8xf32>, vector<8x8xf32>, vector<8x8xf32>, vector<8x8xf32> -> vector<8x32xf32>
    %c0_66 = arith.constant 0 : index
    %c0_67 = arith.constant 0 : index
    %76 = vector.load %arg4[%c0_66, %c0_67] : memref<32x32xf32, #tpu.memory_space<vmem>>, vector<32x32xf32>
    %cst_68 = arith.constant dense<0.000000e+00> : vector<8x32xf32>
    %77 = tpu.matmul %75, %76, %cst_68 {dimension_numbers = #tpu.dot_dimension_numbers<[1], [0], [0], [1], [0, 0, 1, 1], [], []>} : vector<8x32xf32>, vector<32x32xf32>, vector<8x32xf32> -> vector<8x32xf32>
    %78 = vector.broadcast %7 : vector<1x32xf32> to vector<8x32xf32>
    %79 = arith.addf %77, %78 : vector<8x32xf32>
    %80 = arith.addf %79, %1 : vector<8x32xf32>
    %cst_69 = arith.constant dense<0.000000e+00> : vector<8xf32>
    %81 = vector.multi_reduction <add>, %80, %cst_69 [1] : vector<8x32xf32> to vector<8xf32>
    %82 = vector.shape_cast %81 : vector<8xf32> to vector<8x1xf32>
    %cst_70 = arith.constant 3.200000e+01 : f32
    %83 = vector.broadcast %cst_70 : f32 to vector<8x1xf32>
    %84 = arith.divf %82, %83 : vector<8x1xf32>
    %85 = vector.broadcast %84 : vector<8x1xf32> to vector<8x32xf32>
    %86 = arith.subf %80, %85 : vector<8x32xf32>
    %87 = arith.mulf %86, %86 : vector<8x32xf32>
    %cst_71 = arith.constant dense<0.000000e+00> : vector<8xf32>
    %88 = vector.multi_reduction <add>, %87, %cst_71 [1] : vector<8x32xf32> to vector<8xf32>
    %89 = vector.shape_cast %88 : vector<8xf32> to vector<8x1xf32>
    %cst_72 = arith.constant 3.200000e+01 : f32
    %90 = vector.broadcast %cst_72 : f32 to vector<8x1xf32>
    %91 = arith.divf %89, %90 : vector<8x1xf32>
    %cst_73 = arith.constant 9.99999996E-13 : f32
    %92 = vector.broadcast %cst_73 : f32 to vector<8x1xf32>
    %93 = arith.addf %91, %92 : vector<8x1xf32>
    %94 = math.rsqrt %93 : vector<8x1xf32>
    %95 = vector.broadcast %94 : vector<8x1xf32> to vector<8x32xf32>
    %96 = arith.mulf %86, %95 : vector<8x32xf32>
    %97 = vector.broadcast %8 : vector<1x32xf32> to vector<8x32xf32>
    %98 = arith.mulf %96, %97 : vector<8x32xf32>
    %99 = vector.broadcast %9 : vector<1x32xf32> to vector<8x32xf32>
    %100 = arith.addf %98, %99 : vector<8x32xf32>
    %c0_74 = arith.constant 0 : index
    %c0_75 = arith.constant 0 : index
    %101 = vector.load %arg5[%c0_74, %c0_75] : memref<32x128xf32, #tpu.memory_space<vmem>>, vector<32x128xf32>
    %cst_76 = arith.constant dense<0.000000e+00> : vector<8x128xf32>
    %102 = tpu.matmul %100, %101, %cst_76 {dimension_numbers = #tpu.dot_dimension_numbers<[1], [0], [0], [1], [0, 0, 1, 1], [], []>} : vector<8x32xf32>, vector<32x128xf32>, vector<8x128xf32> -> vector<8x128xf32>
    %103 = vector.broadcast %10 : vector<1x128xf32> to vector<8x128xf32>
    %104 = arith.addf %102, %103 : vector<8x128xf32>
    %cst_77 = arith.constant 5.000000e-01 : f32
    %105 = vector.broadcast %cst_77 : f32 to vector<8x128xf32>
    %106 = arith.mulf %104, %105 : vector<8x128xf32>
    %cst_78 = arith.constant 0.707106769 : f32
    %107 = vector.broadcast %cst_78 : f32 to vector<8x128xf32>
    %108 = arith.mulf %104, %107 : vector<8x128xf32>
    %cst_79 = arith.constant 0.000000e+00 : f32
    %109 = vector.broadcast %cst_79 : f32 to vector<8x128xf32>
    %110 = arith.cmpf oge, %108, %109 : vector<8x128xf32>
    %cst_80 = arith.constant 1.000000e+00 : f32
    %cst_81 = arith.constant -1.000000e+00 : f32
    %111 = vector.broadcast %cst_80 : f32 to vector<8x128xf32>
    %112 = vector.broadcast %cst_81 : f32 to vector<8x128xf32>
    %113 = arith.select %110, %111, %112 : vector<8x128xi1>, vector<8x128xf32>
    %114 = math.absf %108 : vector<8x128xf32>
    %cst_82 = arith.constant 0.327591091 : f32
    %115 = vector.broadcast %cst_82 : f32 to vector<8x128xf32>
    %116 = arith.mulf %115, %114 : vector<8x128xf32>
    %cst_83 = arith.constant 1.000000e+00 : f32
    %117 = vector.broadcast %cst_83 : f32 to vector<8x128xf32>
    %118 = arith.addf %117, %116 : vector<8x128xf32>
    %119 = tpu.reciprocal %118 : vector<8x128xf32> -> vector<8x128xf32>
    %cst_84 = arith.constant 1.06140542 : f32
    %120 = vector.broadcast %cst_84 : f32 to vector<8x128xf32>
    %121 = arith.mulf %120, %119 : vector<8x128xf32>
    %cst_85 = arith.constant -1.45315206 : f32
    %122 = vector.broadcast %cst_85 : f32 to vector<8x128xf32>
    %123 = arith.addf %121, %122 : vector<8x128xf32>
    %124 = arith.mulf %123, %119 : vector<8x128xf32>
    %cst_86 = arith.constant 1.42141378 : f32
    %125 = vector.broadcast %cst_86 : f32 to vector<8x128xf32>
    %126 = arith.addf %124, %125 : vector<8x128xf32>
    %127 = arith.mulf %126, %119 : vector<8x128xf32>
    %cst_87 = arith.constant -0.284496725 : f32
    %128 = vector.broadcast %cst_87 : f32 to vector<8x128xf32>
    %129 = arith.addf %127, %128 : vector<8x128xf32>
    %130 = arith.mulf %129, %119 : vector<8x128xf32>
    %cst_88 = arith.constant 0.254829586 : f32
    %131 = vector.broadcast %cst_88 : f32 to vector<8x128xf32>
    %132 = arith.addf %130, %131 : vector<8x128xf32>
    %133 = arith.mulf %132, %119 : vector<8x128xf32>
    %cst_89 = arith.constant 0.000000e+00 : f32
    %134 = vector.broadcast %cst_89 : f32 to vector<8x128xf32>
    %135 = arith.subf %134, %114 : vector<8x128xf32>
    %136 = arith.mulf %135, %114 : vector<8x128xf32>
    %137 = math.exp %136 : vector<8x128xf32>
    %138 = arith.mulf %133, %137 : vector<8x128xf32>
    %cst_90 = arith.constant 1.000000e+00 : f32
    %139 = vector.broadcast %cst_90 : f32 to vector<8x128xf32>
    %140 = arith.subf %139, %138 : vector<8x128xf32>
    %141 = arith.mulf %113, %140 : vector<8x128xf32>
    %cst_91 = arith.constant 1.000000e+00 : f32
    %142 = vector.broadcast %cst_91 : f32 to vector<8x128xf32>
    %143 = arith.addf %142, %141 : vector<8x128xf32>
    %144 = arith.mulf %106, %143 : vector<8x128xf32>
    %c0_92 = arith.constant 0 : index
    %c0_93 = arith.constant 0 : index
    %145 = vector.load %arg6[%c0_92, %c0_93] : memref<128x32xf32, #tpu.memory_space<vmem>>, vector<128x32xf32>
    %cst_94 = arith.constant dense<0.000000e+00> : vector<8x32xf32>
    %146 = tpu.matmul %144, %145, %cst_94 {dimension_numbers = #tpu.dot_dimension_numbers<[1], [0], [0], [1], [0, 0, 1, 1], [], []>} : vector<8x128xf32>, vector<128x32xf32>, vector<8x32xf32> -> vector<8x32xf32>
    %147 = vector.broadcast %11 : vector<1x32xf32> to vector<8x32xf32>
    %148 = arith.addf %146, %147 : vector<8x32xf32>
    %149 = arith.addf %148, %100 : vector<8x32xf32>
    %cst_95 = arith.constant dense<0.000000e+00> : vector<8xf32>
    %150 = vector.multi_reduction <add>, %149, %cst_95 [1] : vector<8x32xf32> to vector<8xf32>
    %151 = vector.shape_cast %150 : vector<8xf32> to vector<8x1xf32>
    %cst_96 = arith.constant 3.200000e+01 : f32
    %152 = vector.broadcast %cst_96 : f32 to vector<8x1xf32>
    %153 = arith.divf %151, %152 : vector<8x1xf32>
    %154 = vector.broadcast %153 : vector<8x1xf32> to vector<8x32xf32>
    %155 = arith.subf %149, %154 : vector<8x32xf32>
    %156 = arith.mulf %155, %155 : vector<8x32xf32>
    %cst_97 = arith.constant dense<0.000000e+00> : vector<8xf32>
    %157 = vector.multi_reduction <add>, %156, %cst_97 [1] : vector<8x32xf32> to vector<8xf32>
    %158 = vector.shape_cast %157 : vector<8xf32> to vector<8x1xf32>
    %cst_98 = arith.constant 3.200000e+01 : f32
    %159 = vector.broadcast %cst_98 : f32 to vector<8x1xf32>
    %160 = arith.divf %158, %159 : vector<8x1xf32>
    %cst_99 = arith.constant 9.99999996E-13 : f32
    %161 = vector.broadcast %cst_99 : f32 to vector<8x1xf32>
    %162 = arith.addf %160, %161 : vector<8x1xf32>
    %163 = math.rsqrt %162 : vector<8x1xf32>
    %164 = vector.broadcast %163 : vector<8x1xf32> to vector<8x32xf32>
    %165 = arith.mulf %155, %164 : vector<8x32xf32>
    %166 = vector.broadcast %12 : vector<1x32xf32> to vector<8x32xf32>
    %167 = arith.mulf %165, %166 : vector<8x32xf32>
    %168 = vector.broadcast %13 : vector<1x32xf32> to vector<8x32xf32>
    %169 = arith.addf %167, %168 : vector<8x32xf32>
    %c0_100 = arith.constant 0 : index
    %c0_101 = arith.constant 0 : index
    %c0_102 = arith.constant 0 : index
    %170 = vector.load %arg8[%c0_100, %c0_101, %c0_102] : memref<1x8x32xf32, #tpu.memory_space<vmem>>, vector<1x8x32xf32>
    %171 = vector.shape_cast %170 : vector<1x8x32xf32> to vector<8x32xf32>
    %172 = vector.shape_cast %169 : vector<8x32xf32> to vector<1x8x32xf32>
    tpu.vector_store %arg8[%c0_100, %c0_101, %c0_102], %172 {strides = array<i32>} : memref<1x8x32xf32, #tpu.memory_space<vmem>>, vector<1x8x32xf32>,
    return
  }
  func.func @transform_0(%arg0: i32) -> (i32, i32, i32) {
    %c0_i32 = arith.constant 0 : i32
    %c0_i32_0 = arith.constant 0 : i32
    %c0_i32_1 = arith.constant 0 : i32
    return %arg0, %c0_i32, %c0_i32_0 : i32, i32, i32
  }
  func.func @transform_1(%arg0: i32) -> (i32, i32, i32, i32) {
    %c0_i32 = arith.constant 0 : i32
    %c0_i32_0 = arith.constant 0 : i32
    %c0_i32_1 = arith.constant 0 : i32
    %c0_i32_2 = arith.constant 0 : i32
    return %arg0, %c0_i32, %c0_i32_0, %c0_i32_1 : i32, i32, i32, i32
  }
  func.func @transform_2(%arg0: i32) -> (i32, i32) {
    %c0_i32 = arith.constant 0 : i32
    %c0_i32_0 = arith.constant 0 : i32
    %c0_i32_1 = arith.constant 0 : i32
    return %c0_i32, %c0_i32_0 : i32, i32
  }
  func.func @transform_3(%arg0: i32) -> (i32, i32) {
    %c0_i32 = arith.constant 0 : i32
    %c0_i32_0 = arith.constant 0 : i32
    %c0_i32_1 = arith.constant 0 : i32
    return %c0_i32, %c0_i32_0 : i32, i32
  }
  func.func @transform_4(%arg0: i32) -> (i32, i32) {
    %c0_i32 = arith.constant 0 : i32
    %c0_i32_0 = arith.constant 0 : i32
    %c0_i32_1 = arith.constant 0 : i32
    return %c0_i32, %c0_i32_0 : i32, i32
  }
  func.func @transform_5(%arg0: i32) -> (i32, i32) {
    %c0_i32 = arith.constant 0 : i32
    %c0_i32_0 = arith.constant 0 : i32
    %c0_i32_1 = arith.constant 0 : i32
    return %c0_i32, %c0_i32_0 : i32, i32
  }
  func.func @transform_6(%arg0: i32) -> (i32, i32) {
    %c0_i32 = arith.constant 0 : i32
    %c0_i32_0 = arith.constant 0 : i32
    %c0_i32_1 = arith.constant 0 : i32
    return %c0_i32, %c0_i32_0 : i32, i32
  }
  func.func @transform_7(%arg0: i32) -> (i32, i32, i32) {
    %c0_i32 = arith.constant 0 : i32
    %c0_i32_0 = arith.constant 0 : i32
    %c0_i32_1 = arith.constant 0 : i32
    return %arg0, %c0_i32, %c0_i32_0 : i32, i32, i32
  }
}

</mosaic_0001>

<bundles_post_ra>
// kernel: tpu_custom_call.1
= control target key start
LH: loop header
LB: loop body
LE: loop exit
PB: predicated region body
PF: predicated region fallthrough
CT: control target
= control target key end

     0   :  { %12 = vsyncpa [#allocation7], 0  ;;  %s1776_s0 = inlined_call_operand.vmem [shape: f32[2,8,32], index: 0, kind: input, shape index: {}]   ;;  %s1777_s1 = inlined_call_operand.vmem [shape: f32[2,1,1,8], index: 1, kind: input, shape index: {}]   ;;  %s1778_s2 = inlined_call_operand.vmem [shape: f32[32,96], index: 2, kind: input, shape index: {}]   ;;  %s1779_s3 = inlined_call_operand.vmem [shape: f32[32,32], index: 3, kind: input, shape index: {}]   ;;  %s1780_s4 = inlined_call_operand.vmem [shape: f32[32,128], index: 4, kind: input, shape index: {}]   ;;  %s1781_s5 = inlined_call_operand.vmem [shape: f32[128,32], index: 5, kind: input, shape index: {}]   ;;  %s1782_s6 = inlined_call_operand.vmem [shape: f32[8,128], index: 6, kind: input, shape index: {}]   ;;  %s1783_s7 = inlined_call_operand.hbm [shape: f32[2,8,32], index: 7, kind: output, shape index: {}]  }
   0x1   :  { %14 = vsyncpa [#allocation7 + $0x1], 0  ;;  %s1458_s24 = smov 0   ;;  %s1460_s25 = smov 0  }
   0x2   :  { %s1462_s26 = smov 0   ;;  %s1464_s27 = smov 0  }
   0x3 LB: > { %s1479_s28 = sadd.s32 4294967295, %s1391_s27   ;;  %s1064_s29 = sadd.s32 4294967294, %s1391_s27   ;;  %s1391_s27 = sphi %s1464_s27, %s1789_s27   ;;  %s1387_s26 = sphi %s1462_s26, %s1788_s26   ;;  %s1383_s25 = sphi %s1460_s25, %s1787_s25   ;;  %s1379_s24 = sphi %s1458_s24, %s1786_s24  }
   0x4   : > { %s1483_s30 = sadd.s32 1, %s1391_s27   ;;  %s184_s8 = sadd.s32 1, %s1387_s26 }
   0x5   : > { %s181_s9 = ssub.s32 %s1391_s27, %s1483_s30  ;;  %p194_p0 = scmp.ne.s32.totalorder %s1387_s26, %s1383_s25 }
   0x6   : > { %p182_p1 = scmp.eq.s32.totalorder %s181_s9, 0  ;;  %p195_p2 = scmp.eq.s32.totalorder %s1479_s28, 1 }
   0x7   : > { %p200_p3 = scmp.ne.s32.totalorder %s1383_s25, %s1379_s24  ;;  %p201_p4 = scmp.eq.s32.totalorder %s1064_s29, 1 }
   0x8   : > { %s1494_s10 = scalar_select %p182_p1, %s1387_s26, %s184_s8  }
   0x9   : > { %p1496_p5 = por %p195_p2, %p194_p0  ;;  %p1500_p6 = por %p201_p4, %p200_p3 }
   0xa   : > { %p1067_p7 = scmp.ge.s32.totalorder %s1391_s27, 1  ;;  %p247_p8 = scmp.lt.s32.totalorder %s1391_s27, 3 }
   0xc   : > { %p248_p9 = pnand %p1067_p7, %p247_p8 }
   0xd   : > { %s278_s13 = sand.u32 (!%p248_p9), 1, %s1383_s25   ;;  %v1510_v0 = vld [vmem:[%s1782_s6 + $0x1] ss:$0 sm:$0xff] (!%p248_p9)  ;;  %v1515_v1 = vld [vmem:[%s1782_s6 + $0x2] ss:$0 sm:$0xff] (!%p248_p9)  ;;  %v1397_v4 = vmov (!%p248_p9), 0.0|0.0  }
   0xe   : > { %251 = sbr.rel (%p248_p9) target bundleno = 2584 (0xa18), region = 48  ;;  %s1519_s18 = sshll.u32 (!%p248_p9), %s278_s13, 3  ;;  %v1524_v2 = vld [vmem:[%s1782_s6 + $0x3] ss:$0 sm:$0xff] (!%p248_p9)  ;;  %v1529_v3 = vld [vmem:[%s1782_s6 + $0x4] ss:$0 sm:$0xff] (!%p248_p9)  ;;  %1204 = vmatprep.subr.bf16.mxu0 (!%p248_p9), %v1397_v4 }
   0xf   : > { %v304_v5 = vld [vmem:[%s1778_s2] sm:$0xff] (!%p248_p9)  ;;  %v305_v8 = vld [vmem:[%s1778_s2 + $0x8] sm:$0xff] (!%p248_p9)  ;;  %v306_v11 = vld [vmem:[%s1778_s2 + $0x10] sm:$0xff] (!%p248_p9)  ;;  %vm1398_vm0 = vmmov (!%p248_p9), 0   ;;  %v1399_v13 = vmov (!%p248_p9), 0.0   ;;  %p281_p10 = scmp.lt.s32.totalorder (!%p248_p9), %s1479_s28, 1 }
  0x10   : > { %v1538_v6 = vld [vmem:[%s1782_s6 + $0x5] ss:$0 sm:$0xff] (!%p248_p9)  ;;  %v1543_v7 = vld [vmem:[%s1782_s6 + $0x6] ss:$0 sm:$0xff] (!%p248_p9)  ;;  %v1551_v9 = vld [vmem:[%s1782_s6 + $0x7] ss:$0 sm:$0xff] (!%p248_p9)  ;;  %v1205_v10 = vpack.c.bf16 (!%p248_p9), %v305_v8, %v304_v5  ;;  %1134 = vmatprep.mubr.msk.f32.mxu0 (!%p248_p9), %vm1398_vm0, %v1399_v13 }
  0x11   : > { %v307_v12 = vld [vmem:[%s1778_s2 + $0x18] sm:$0xff] (!%p248_p9)  ;;  %vm312_vm1 = vcmask (!%p248_p9), 261120   ;;  %v1071_v17 = vld [vmem:[%s1782_s6] ss:$0 sm:$0xff] (!%p248_p9)  ;;  %vm386_vm2 = vcmask (!%p248_p9), 64512   ;;  %s1400_s23 = smov (!%p248_p9), 120  }
  0x12   : > { %1206 = vmatpush3.bf16.msra.mxu0 (!%p248_p9), %v1205_v10  ;;  %v1208_v14 = vpack.c.bf16 (!%p248_p9), %v307_v12, %v306_v11  ;;  %s1401_s29 = smov (!%p248_p9), 96   ;;  %s1404_s14 = smov (!%p248_p9), 112  }
  0x13   : > { %1207 = vmatprep.subr.bf16.mxu0 (!%p248_p9), %v1397_v4  ;;  %s1405_s15 = smov (!%p248_p9), 56   ;;  %s1407_s17 = smov (!%p248_p9), 80  }
  0x14   : > { %s1408_s19 = smov (!%p248_p9), 72   ;;  %s1410_s21 = smov (!%p248_p9), 40  }
  0x15   : > { %s282_s8 = scalar_select %p281_p10, %s1479_s28, 1 }
  0x16   : > { %1209 = vmatpush3.bf16.msra.mxu0 %v1208_v14  ;;  %s280_s22 = scalar_lea.vmem [#allocation6], %s1519_s18 }
  0x17   : > { %s1069_s9 = sshll.u32 %s282_s8, 3  ;;  %s287_s16 = scalar_lea.vmem %s1777_s1, %s282_s8 }
  0x18   : > { %s284_s20 = scalar_lea.vmem %s1776_s0, %s1069_s9  ;;  %v1570_v15 = vld [vmem:[%s287_s16] ss:$0 sm:$0xff]  ;;  %s1402_s8 = smov 88  }
  0x19   : > { %v1572_v16 = vld [vmem:[%s284_s20] sm:$0xff]  ;;  %s1403_s9 = smov 64   ;;  %s1406_s16 = smov 48  }
  0x1a   : > { %1135 = vmatmul.mubr.msk.f32.vlgmr.msra.gmra.mrb[0].mxu0 %vm312_vm1, %v1572_v16  ;;  %s1409_s20 = smov 104  }
  0xed   : > { %v382_v18 = vpop.f32.mrb[0].mxu0 }
  0xee   : > { %v383_v19 = vadd.f32 %v1071_v17, %v382_v18  ;;  %v1136_v20 = vpop.f32.mrb[1].mxu0 }
  0xf0   : > { %397 = vrot.lane.b32.xlu1 %v383_v19, %s1400_s23  ;;  %389 = vrot.lane.b32.xlu0 %v383_v19, %s1401_s29  ;;  %387 = vst.msk [vmem:[#allocation2] sm:$0xff] %vm386_vm2, %v383_v19  ;;  %s1592_s23 = smov 0  }
  0xf4   : > { %402 = vrot.lane.b32.xlu1 %v383_v19, %s1402_s8  ;;  %393 = vrot.lane.b32.xlu0 %v383_v19, %s1403_s9 }
  0xf8   : > { %412 = vrot.lane.b32.xlu1 %v383_v19, %s1404_s14  ;;  %407 = vrot.lane.b32.xlu0 %v383_v19, %s1405_s15 }
  0xfc   : > { %422 = vrot.lane.b32.xlu1 %v383_v19, %s1406_s16  ;;  %417 = vrot.lane.b32.xlu0 %v383_v19, %s1407_s17 }
 0x100   : > { %432 = vrot.lane.b32.xlu1 %v383_v19, %s1408_s19  ;;  %427 = vrot.lane.b32.xlu0 %v383_v19, %s1409_s20 }
 0x104   : > { %437 = vrot.lane.b32.xlu0 %v383_v19, %s1410_s21 }
 0x162   : > { %v398_v21 = vpop.permute.xlu1 %397  ;;  %v390_v22 = vpop.permute.xlu0 %389 }
 0x163   : > { %401 = vst.msk [vmem:[#allocation2 + $0x8] sm:$0xff] %vm386_vm2, %v398_v21  ;;  %392 = vst.msk [vmem:[#allocation3] sm:$0xff] %vm386_vm2, %v390_v22 }
 0x166   : > { %v403_v23 = vpop.permute.xlu1 %402  ;;  %v394_v24 = vpop.permute.xlu0 %393 }
 0x167   : > { %406 = vst.msk [vmem:[#allocation3 + $0x8] sm:$0xff] %vm386_vm2, %v403_v23  ;;  %396 = vst.msk [vmem:[#allocation4] sm:$0xff] %vm386_vm2, %v394_v24 }
 0x16a   : > { %v413_v25 = vpop.permute.xlu1 %412  ;;  %v408_v26 = vpop.permute.xlu0 %407 }
 0x16b   : > { %416 = vst.msk [vmem:[#allocation2 + $0x10] sm:$0xff] %vm386_vm2, %v413_v25  ;;  %411 = vst.msk [vmem:[#allocation4 + $0x8] sm:$0xff] %vm386_vm2, %v408_v26 }
 0x16e   : > { %v423_v27 = vpop.permute.xlu1 %422  ;;  %v418_v28 = vpop.permute.xlu0 %417 }
 0x16f   : > { %426 = vst.msk [vmem:[#allocation4 + $0x10] sm:$0xff] %vm386_vm2, %v423_v27  ;;  %421 = vst.msk [vmem:[#allocation3 + $0x10] sm:$0xff] %vm386_vm2, %v418_v28 }
 0x172   : > { %v433_v29 = vpop.permute.xlu1 %432  ;;  %v428_v30 = vpop.permute.xlu0 %427 }
 0x173   : > { %436 = vst.msk [vmem:[#allocation3 + $0x18] sm:$0xff] %vm386_vm2, %v433_v29  ;;  %431 = vst.msk [vmem:[#allocation2 + $0x18] sm:$0xff] %vm386_vm2, %v428_v30 }
 0x176   : > { %v438_v31 = vpop.permute.xlu0 %437 }
 0x177   : > { %441 = vst.msk [vmem:[#allocation4 + $0x18] sm:$0xff] %vm386_vm2, %v438_v31 }
 0x178 LB: >> { %v1411_v32 = vmov 0.0   ;;  %vm1412_vm3 = vmmov 0   ;;  %s1598_s29 = sshll.u32 %s1395_s23, 3  ;;  %s447_s23 = sadd.s32 1, %s1395_s23   ;;  %s1395_s23 = sphi %s1592_s23, %s447_s23  }
 0x179   : >> { %1137 = vmatprep.subr.mxu0 %v1411_v32  ;;  %1139 = vmatprep.mubr.msk.f32.mxu0 %vm1412_vm3, %v1411_v32  ;;  %s451_s8 = scalar_lea.vmem [#allocation3], %s1598_s29  ;;  %s449_s9 = scalar_lea.vmem [#allocation2], %s1598_s29 }
 0x17a   : >> { %1142 = vmatprep.subr.mxu1 %v1411_v32  ;;  %1144 = vmatprep.mubr.msk.f32.mxu1 %vm1412_vm3, %v1411_v32  ;;  %v452_v33 = vld [vmem:[%s451_s8] sm:$0xff]  ;;  %s540_s14 = scalar_lea.vmem [#allocation4], %s1598_s29  ;;  %s615_s15 = scalar_lea.vmem [#allocation5], %s1598_s29 }
 0x17b   : >> { %1138 = vmatpush3.xpose.msk.msra.mxu0 %vm386_vm2, %v452_v33  ;;  %v450_v34 = vld [vmem:[%s449_s9] sm:$0xff]  ;;  %p444_p11 = scmp.ge.s32.totalorder %s447_s23, 4  }
 0x17c   : > { %s1413_s16 = smov (%p444_p11), 8   ;;  %v641_v52 = vld [vmem:[%s1779_s3] sm:$0xff] (%p444_p11)  ;;  %v642_v53 = vld [vmem:[%s1779_s3 + $0x8] sm:$0xff] (%p444_p11)  ;;  %1222 = vmatprep.subr.bf16.mxu0 (%p444_p11), %v1397_v4  ;;  %s1414_s23 = smov (%p444_p11), 24   ;;  %v643_v56 = vld [vmem:[%s1779_s3 + $0x10] sm:$0xff] (%p444_p11)  ;;  %vm637_vm4 = vcmask (%p444_p11), 130048  }
 0x17d   : > { %v1211_v55 = vpack.c.bf16 (%p444_p11), %v642_v53, %v641_v52  ;;  %v644_v57 = vld [vmem:[%s1779_s3 + $0x18] sm:$0xff] (%p444_p11)  ;;  %vm639_vm5 = vcmask (%p444_p11), 195584   ;;  %v854_v32 = vld [vmem:[%s1781_s5] sm:$0xff] (%p444_p11)  ;;  %v855_v33 = vld [vmem:[%s1781_s5 + $0x8] sm:$0xff] (%p444_p11)  ;;  %s1087_s8 = sshll.u32 (%p444_p11), %s1479_s28, 7  ;;  %s983_s9 = sshll.u32 (%p444_p11), %s280_s22, 4  ;;  %s1731_s9 = int_to_ptr.vmem [resolvable:$true] %s983_s9 }
 0x17e   : >> { %1140 = vmatmul.mubr.msk.f32.vlgmr.msra.gmra.mrb[0].mxu0 %vm386_vm2, %v450_v34  ;;  %v541_v44 = vld [vmem:[%s540_s14] sm:$0xff]  ;;  %v1214_v58 = vpack.c.bf16 (%p444_p11), %v644_v57, %v643_v56  ;;  %v750_v23 = vld [vmem:[%s1780_s4 + $0x18] sm:$0xff] (%p444_p11)  ;;  %v856_v34 = vld [vmem:[%s1781_s5 + $0x10] sm:$0xff] (%p444_p11)  ;;  %s970_s28 = scalar_lea.sflag (%p444_p11), [#allocation7], %s278_s13  ;;  %s1325_s17 = scalar_lea.vmem (%p444_p11), %s1731_s9, 128 }
 0x17f   : >> { %1143 = vmatpush3.msra.mxu1 %v541_v44  ;;  %1201 = vmatprep.mubr.msk.f32.mxu0 (%p444_p11), %vm1398_vm0, %v1399_v13  ;;  %v869_v52 = vld [vmem:[%s1781_s5 + $0x78] sm:$0xff] (%p444_p11)  ;;  %p1326_p12 = scmp.ne.s32.totalorder (%p444_p11), %s1731_s9, %s1325_s17  ;;  %s1417_s19 = smov (%p444_p11), [#allocation6]  }
 0x180   : > { %1210 = vmatprep.subr.bf16.mxu1 (%p444_p11), %v1397_v4  ;;  %s1329_s20 = sshll.u32 (%p444_p11), %s1417_s19, 4  ;;  %s1330_s20 = int_to_ptr.vmem [resolvable:$false] %s1329_s20 }
 0x181   : > { %p1327_p13 = pnand (%p444_p11), %p1326_p12, %p1496_p5  ;;  %s1331_s21 = scalar_lea.vmem (%p444_p11), %s1330_s20, 256 }
 0x182   : > { %p1332_p1 = scmp.lt.s32.totalorder (%p444_p11), %s1731_s9, %s1330_s20  ;;  %p1333_p2 = scmp.lt.s32.totalorder (%p444_p11), %s1331_s21, %s1325_s17 }
 0x183   : > { %p1328_p0 = pneg (%p444_p11), %p1327_p13 }
 0x184   : > { %p1334_p3 = por (%p444_p11), %p1333_p2, %p1332_p1 }
 0x186   : > { %p1335_p4 = pnand (%p444_p11), %p1334_p3, %p1328_p0 }
 0x251   : >> { %v525_v35 = vpop.f32.mrb[0].mxu0 }
 0x252   : >> { %v526_v36 = vadd.f32 %v1570_v15, %v525_v35  ;;  %v1141_v37 = vpop.f32.mrb[1].mxu0  ;;  %v1223_v35 = vpack.c.bf16 (%p444_p11), %v855_v33, %v854_v32 }
 0x253   : > { %v859_v37 = vld [vmem:[%s1781_s5 + $0x28] sm:$0xff] (%p444_p11) }
 0x254   : >> { %v529_v38 = vsel %vm386_vm2, %v526_v36, -inf  ;;  %1224 = vmatpush3.bf16.msra.mxu0 (%p444_p11), %v1223_v35 }
 0x255   : >> { %530 = vmax.xlane.f32.xlu0 %v529_v38  ;;  %1225 = vmatprep.subr.bf16.mxu0 (%p444_p11), %v1397_v4 }
 0x2e2   : >> { %v531_v39 = vpop.xlane.xlu0 %530 }
 0x2e3   : >> { %v532_v40 = vsub.f32 %v526_v36, %v531_v39  ;;  %v858_v36 = vld [vmem:[%s1781_s5 + $0x20] sm:$0xff] (%p444_p11)  ;;  %v860_v39 = vld [vmem:[%s1781_s5 + $0x30] sm:$0xff] (%p444_p11) }
 0x2e4   : > { %v1229_v38 = vpack.c.bf16 (%p444_p11), %v859_v37, %v858_v36 }
 0x2e5   : >> { %v533_v41 = vmul.f32 1.442695, %v532_v40  ;;  %v861_v40 = vld [vmem:[%s1781_s5 + $0x38] sm:$0xff] (%p444_p11) }
 0x2e7   : >> { %1313 = vpow2.f32 %v533_v41  ;;  %v1232_v41 = vpack.c.bf16 (%p444_p11), %v861_v40, %v860_v39 }
 0x2f1   : >> { %v1314_v42 = vpop.eup %1313 }
 0x2f2   : >> { %v535_v43 = vsel %vm386_vm2, %v1314_v42, 0.0 }
 0x2f3   : >> { %536 = vadd.xlane.f32.xlu0 %v535_v43  ;;  %v863_v43 = vld [vmem:[%s1781_s5 + $0x48] sm:$0xff] (%p444_p11) }
 0x380   : >> { %v537_v45 = vpop.xlane.xlu0 %536 }
 0x381   : >> { %1315 = vrcp.f32 %v537_v45  ;;  %v864_v45 = vld [vmem:[%s1781_s5 + $0x50] sm:$0xff] (%p444_p11) }
 0x38b   : >> { %v1316_v46 = vpop.eup %1315 }
 0x38c   : >> { %v539_v47 = vmul.f32 %v1316_v46, %v1314_v42  ;;  %v862_v42 = vld [vmem:[%s1781_s5 + $0x40] sm:$0xff] (%p444_p11)  ;;  %v865_v46 = vld [vmem:[%s1781_s5 + $0x58] sm:$0xff] (%p444_p11) }
 0x38d   : > { %v1235_v44 = vpack.c.bf16 (%p444_p11), %v863_v43, %v862_v42 }
 0x38e   : >> { %1145 = vmatmul.mubr.msk.f32.vlgmr.msra.gmra.mrb[0].mxu1 %vm386_vm2, %v539_v47  ;;  %v1238_v47 = vpack.c.bf16 (%p444_p11), %v865_v46, %v864_v45 }
 0x38f   : > { %1155 = vmatprep.mubr.msk.f32.mxu1 (%p444_p11), %vm1398_vm0, %v1399_v13  ;;  %1212 = vmatpush3.bf16.msra.mxu1 (%p444_p11), %v1211_v55 }
 0x390   : > { %1213 = vmatprep.subr.bf16.mxu1 (%p444_p11), %v1397_v4 }
 0x393   : > { %1215 = vmatpush3.bf16.msra.mxu1 (%p444_p11), %v1214_v58 }
 0x394   : > { %1216 = vmatprep.subr.bf16.mxu1 (%p444_p11), %v1397_v4 }
 0x45c   : > { %446 = sbr.rel (!%p444_p11) target bundleno = 376 (0x178), region = 109 }
 0x461   : >> { %v611_v48 = vpop.f32.mrb[0].mxu1 }
 0x462   : >> { %616 = vst.msk [vmem:[%s615_s15] sm:$0xff] %vm386_vm2, %v611_v48  ;;  %v1146_v49 = vpop.f32.mrb[1].mxu1  ;;  %s1415_s15 = smov (%p444_p11), 16   ;;  %v866_v48 = vld [vmem:[%s1781_s5 + $0x60] sm:$0xff] (%p444_p11) }
 0x463   : > { %v867_v49 = vld [vmem:[%s1781_s5 + $0x68] sm:$0xff] }
 0x469   : > { %v619_v50 = vld [vmem:[#allocation5 + $0x8] sm:$0xff]  ;;  %v623_v51 = vld [vmem:[#allocation5 + $0x18] sm:$0xff]  ;;  %v621_v54 = vld [vmem:[#allocation5 + $0x10] sm:$0xff] }
 0x46a   : > { %625 = vrot.lane.b32.xlu0 %v619_v50, %s1413_s16  ;;  %633 = vrot.lane.b32.xlu1 %v623_v51, %s1414_s23  ;;  %v617_v60 = vld [vmem:[#allocation5] sm:$0xff]  ;;  %v1241_v50 = vpack.c.bf16 %v867_v49, %v866_v48  ;;  %v868_v51 = vld [vmem:[%s1781_s5 + $0x70] sm:$0xff]  ;;  %s1729_s16 = scalar_lea.hbm %s1783_s7, %s1087_s8 }
 0x46b   : > { %v1244_v53 = vpack.c.bf16 %v869_v52, %v868_v51 }
 0x46e   : > { %629 = vrot.lane.b32.xlu0 %v621_v54, %s1415_s15 }
 0x4dc   : > { %v626_v59 = vpop.permute.xlu0 %625  ;;  %v634_v61 = vpop.permute.xlu1 %633 }
 0x4dd   : > { %v636_v62 = vsel %vm386_vm2, %v617_v60, %v626_v59 }
 0x4e0   : > { %v630_v63 = vpop.permute.xlu0 %629 }
 0x4e1   : > { %v638_v5 = vsel %vm637_vm4, %v636_v62, %v630_v63 }
 0x4e2   : > { %v640_v8 = vsel %vm639_vm5, %v638_v5, %v634_v61 }
 0x4e3   : > { %1156 = vmatmul.mubr.msk.f32.vlgmr.msra.gmra.mrb[0].mxu1 %vm312_vm1, %v640_v8 }
 0x4e4   : > { %1166 = vmatprep.mubr.msk.f32.mxu1 %vm1398_vm0, %v1399_v13  ;;  %v747_v13 = vld [vmem:[%s1780_s4] sm:$0xff] }
 0x5b6   : > { %v718_v10 = vpop.f32.mrb[0].mxu1 }
 0x5b7   : > { %v719_v11 = vadd.f32 %v1510_v0, %v718_v10  ;;  %v1157_v12 = vpop.f32.mrb[1].mxu1  ;;  %v748_v0 = vld [vmem:[%s1780_s4 + $0x8] sm:$0xff] }
 0x5b8   : > { %v1217_v22 = vpack.c.bf16 %v748_v0, %v747_v13 }
 0x5b9   : > { %v722_v14 = vadd.f32 %v719_v11, %v1572_v16  ;;  %v749_v16 = vld [vmem:[%s1780_s4 + $0x10] sm:$0xff] }
 0x5ba   : > { %1218 = vmatpush3.bf16.msra.mxu1 %v1217_v22  ;;  %v1220_v24 = vpack.c.bf16 %v750_v23, %v749_v16 }
 0x5bb   : > { %v723_v15 = vsel %vm312_vm1, %v722_v14, 0.0  ;;  %1219 = vmatprep.subr.bf16.mxu1 %v1397_v4 }
 0x5bc   : > { %724 = vadd.xlane.f32.xlu1 %v723_v15 }
 0x5be   : > { %1221 = vmatpush3.bf16.msra.mxu1 %v1220_v24 }
 0x649   : > { %v725_v17 = vpop.xlane.xlu1 %724 }
 0x64a   : > { %v727_v18 = vmul.f32 0.03125, %v725_v17 }
 0x64c   : > { %v728_v19 = vsub.f32 %v722_v14, %v727_v18 }
 0x64e   : > { %v729_v20 = vmul.f32 %v728_v19, %v728_v19 }
 0x650   : > { %v730_v21 = vsel %vm312_vm1, %v729_v20, 0.0 }
 0x651   : > { %731 = vadd.xlane.f32.xlu0 %v730_v21  ;;  %v1416_v21 = vmov -1.0  }
 0x6de   : > { %v732_v25 = vpop.xlane.xlu0 %731 }
 0x6df   : > { %v733_v26 = vmul.f32 0.03125, %v732_v25 }
 0x6e1   : > { %v734_v27 = vadd.f32 1e-12, %v733_v26 }
 0x6e3   : > { %1317 = vrsqrt.f32 %v734_v27 }
 0x6ed   : > { %v1318_v28 = vpop.eup %1317 }
 0x6ee   : > { %v736_v29 = vmul.f32 %v1318_v28, %v728_v19 }
 0x6f0   : > { %v741_v30 = vmul.f32 %v1515_v1, %v736_v29  ;;  %v857_v1 = vld [vmem:[%s1781_s5 + $0x18] sm:$0xff] }
 0x6f2   : > { %v1657_v31 = vadd.f32 %v1524_v2, %v741_v30  ;;  %v1226_v2 = vpack.c.bf16 %v857_v1, %v856_v34 }
 0x6f4   : > { %1167 = vmatmul.mubr.msk.f32.vlgmr.msra.gmra.mrb[2].mxu1 %vm312_vm1, %v1657_v31  ;;  %1227 = vmatpush3.bf16.msra.mxu0 %v1226_v2 }
 0x6f5   : > { %1228 = vmatprep.subr.bf16.mxu0 %v1397_v4 }
 0x6f8   : > { %1230 = vmatpush3.bf16.msra.mxu0 %v1229_v38 }
 0x6f9   : > { %1231 = vmatprep.subr.bf16.mxu0 %v1397_v4 }
 0x6fc   : > { %1233 = vmatpush3.bf16.msra.mxu0 %v1232_v41 }
 0x6fd   : > { %1234 = vmatprep.subr.bf16.mxu0 %v1397_v4 }
 0x700   : > { %1236 = vmatpush3.bf16.msra.mxu0 %v1235_v44 }
 0x701   : > { %1237 = vmatprep.subr.bf16.mxu0 %v1397_v4 }
 0x704   : > { %1239 = vmatpush3.bf16.msra.mxu0 %v1238_v47 }
 0x705   : > { %1240 = vmatprep.subr.bf16.mxu0 %v1397_v4 }
 0x708   : > { %1242 = vmatpush3.bf16.msra.mxu0 %v1241_v50 }
 0x709   : > { %1243 = vmatprep.subr.bf16.mxu0 %v1397_v4 }
 0x70c   : > { %1245 = vmatpush3.bf16.msra.mxu0 %v1244_v53 }
 0x7c7   : > { %v824_v54 = vpop.f32.mrb[2].mxu1 }
 0x7c8   : > { %v825_v55 = vadd.f32 %v1529_v3, %v824_v54  ;;  %v1168_v56 = vpop.f32.mrb[3].mxu1 }
 0x7ca   : > { %v829_v57 = vmul.f32 0.70710677, %v825_v55  ;;  %v828_v16 = vmul.f32 0.5, %v825_v55 }
 0x7cc   : > { %v832_v58 = vand.u32 2147483647, %v829_v57  ;;  %vm830_vm6 = vcmp.ge.f32.partialorder %v829_v57, 0.0 }
 0x7cd   : > { %v831_v13 = vsel %vm830_vm6, 1.0, %v1416_v21 }
 0x7ce   : > { %v833_v59 = vmul.f32 0.3275911, %v832_v58  ;;  %v845_v61 = vsub.f32 0.0, %v832_v58 }
 0x7d0   : > { %v834_v60 = vadd.f32 1.0, %v833_v59  ;;  %v846_v63 = vmul.f32 %v845_v61, %v832_v58 }
 0x7d2   : > { %1319 = vrcp.f32 %v834_v60  ;;  %v847_v10 = vmul.f32 1.442695, %v846_v63 }
 0x7d4   : > { %1321 = vpow2.f32 %v847_v10 }
 0x7dc   : > { %v1320_v62 = vpop.eup %1319 }
 0x7dd   : > { %v836_v5 = vmul.f32 1.0614054, %v1320_v62 }
 0x7de   : > { %v1322_v18 = vpop.eup %1321 }
 0x7df   : > { %v837_v8 = vadd.f32 -1.4531521, %v836_v5 }
 0x7e1   : > { %v838_v11 = vmul.f32 %v1320_v62, %v837_v8 }
 0x7e3   : > { %v839_v12 = vadd.f32 1.4214138, %v838_v11 }
 0x7e5   : > { %v840_v4 = vmul.f32 %v1320_v62, %v839_v12 }
 0x7e7   : > { %v841_v14 = vadd.f32 -0.28449672, %v840_v4 }
 0x7e9   : > { %v842_v15 = vmul.f32 %v1320_v62, %v841_v14 }
 0x7eb   : > { %v843_v17 = vadd.f32 0.2548296, %v842_v15 }
 0x7ed   : > { %v844_v3 = vmul.f32 %v1320_v62, %v843_v17 }
 0x7ef   : > { %v849_v19 = vmul.f32 %v1322_v18, %v844_v3 }
 0x7f1   : > { %v850_v20 = vsub.f32 1.0, %v849_v19 }
 0x7f3   : > { %v851_v0 = vmul.f32 %v850_v20, %v831_v13 }
 0x7f5   : > { %v852_v22 = vadd.f32 1.0, %v851_v0 }
 0x7f7   : > { %v853_v23 = vmul.f32 %v852_v22, %v828_v16 }
 0x7f9   : > { %1202 = vmatmul.mubr.f32.vlgmr.msra.gmra.mrb[0].mxu0 %v853_v23 }
 0x8cc   : > { %v940_v24 = vpop.f32.mrb[0].mxu0 }
 0x8cd   : > { %v941_v25 = vadd.f32 %v1538_v6, %v940_v24  ;;  %v1203_v26 = vpop.f32.mrb[1].mxu0 }
 0x8cf   : > { %v944_v27 = vadd.f32 %v941_v25, %v1657_v31 }
 0x8d1   : > { %v945_v28 = vsel %vm312_vm1, %v944_v27, 0.0 }
 0x8d2   : > { %946 = vadd.xlane.f32.xlu0 %v945_v28 }
 0x95f   : > { %v947_v29 = vpop.xlane.xlu0 %946 }
 0x960   : > { %v948_v30 = vmul.f32 0.03125, %v947_v29 }
 0x962   : > { %v949_v32 = vsub.f32 %v944_v27, %v948_v30 }
 0x964   : > { %v950_v33 = vmul.f32 %v949_v32, %v949_v32 }
 0x966   : > { %v951_v34 = vsel %vm312_vm1, %v950_v33, 0.0 }
 0x967   : > { %952 = vadd.xlane.f32.xlu1 %v951_v34 }
 0x9f4   : > { %v953_v35 = vpop.xlane.xlu1 %952 }
 0x9f5   : > { %v954_v6 = vmul.f32 0.03125, %v953_v35 }
 0x9f7   : > { %v955_v1 = vadd.f32 1e-12, %v954_v6 }
 0x9f9   : > { %1323 = vrsqrt.f32 %v955_v1 }
 0xa03   : > { %v1324_v2 = vpop.eup %1323 }
 0xa04   : > { %v957_v31 = vmul.f32 %v1324_v2, %v949_v32 }
 0xa06   : > { %v962_v36 = vmul.f32 %v1543_v7, %v957_v31 }
 0xa08   : > { %v967_v37 = vadd.f32 %v1551_v9, %v962_v36 }
 0xa0a   : > { %968 = vst.msk [vmem:[%s280_s22] sm:$0xff] %vm312_vm1, %v967_v37 }
 0xa0b   : > { %1338 = shalt.err (!%p1335_p4)
}
 0xa0c   : > { %s1339_s13 = scalar_lea.hbm %s1729_s16, 128  ;;  %s1343_s23 = scalar_lea.hbm %s1783_s7, 256 }
 0xa0d   : > { %p1340_p7 = scmp.ne.s32.totalorder %s1729_s16, %s1339_s13  ;;  %p1344_p10 = scmp.lt.u32.totalorder %s1729_s16, %s1783_s7 }
 0xa0e   : > { %p1345_p11 = scmp.lt.u32.totalorder %s1343_s23, %s1339_s13  ;;  %p1347_p13 = scmp.lt.u32.totalorder %s1339_s13, %s1729_s16 }
 0xa0f   : > { %p1341_p8 = pnand %p1340_p7, %p1496_p5 }
 0xa10   : > { %p1346_p12 = por %p1345_p11, %p1344_p10 }
 0xa11   : > { %p1342_p9 = pneg %p1341_p8 }
 0xa12   : > { %p1348_p0 = por %p1347_p13, %p1346_p12 }
 0xa14   : > { %p1349_p1 = pnand %p1348_p0, %p1342_p9 }
 0xa16   : > { %1352 = shalt.err (!%p1349_p1)
}
 0xa17   : > { %1246 = dma.vmem_to_hbm [thread:$0]  (%p1496_p5), %s1731_s9, 128, %s1729_s16, %s970_s28  }
 0xa18 PF: > { %p1252_p2 = scmp.ge.s32.totalorder %s1391_s27, 2  ;;  %s995_s14 = sand.u32 1, %s1379_s24  }
 0xa19   : > { %s996_s15 = scalar_lea.sflag [#allocation7], %s995_s14 }
 0xa1a   : > { %p1249_p3 = pnand %p1252_p2, %p1500_p6 }
 0xa1c   : > { %1374 = dma.done.wait (!%p1249_p3), %s996_s15, 128  }
 0xa1d   : > { %1376 = vsyncadd (!%p1249_p3), %s996_s15, 4294967168  ;;  %p17_p4 = scmp.ge.s32.totalorder %s1483_s30, 4   ;;  %s1786_s24 = smov %s1383_s25 }
 0xa1e   : > { %s1787_s25 = smov %s1387_s26  ;;  %s1788_s26 = smov %s1494_s10 }
 0xa1f   : > { %s1789_s27 = smov %s1483_s30  ;;  %19 = sbr.rel (!%p17_p4) target bundleno = 3 (0x3), region = 120 }
 0xa26   :  { %1001 = vsyncpa [#allocation7], 1 }
 0xa27   :  { %1003 = vsyncpa [#allocation7 + $0x1], 1 }

// kernel: tpu_custom_call.1
= control target key start
LH: loop header
LB: loop body
LE: loop exit
PB: predicated region body
PF: predicated region fallthrough
CT: control target
= control target key end

     0   :  { %12 = vsyncpa [#allocation7], 0  ;;  %s1776_s0 = inlined_call_operand.vmem [shape: f32[2,8,32], index: 0, kind: input, shape index: {}]   ;;  %s1777_s1 = inlined_call_operand.vmem [shape: f32[2,1,1,8], index: 1, kind: input, shape index: {}]   ;;  %s1778_s2 = inlined_call_operand.vmem [shape: f32[32,96], index: 2, kind: input, shape index: {}]   ;;  %s1779_s3 = inlined_call_operand.vmem [shape: f32[32,32], index: 3, kind: input, shape index: {}]   ;;  %s1780_s4 = inlined_call_operand.vmem [shape: f32[32,128], index: 4, kind: input, shape index: {}]   ;;  %s1781_s5 = inlined_call_operand.vmem [shape: f32[128,32], index: 5, kind: input, shape index: {}]   ;;  %s1782_s6 = inlined_call_operand.vmem [shape: f32[8,128], index: 6, kind: input, shape index: {}]   ;;  %s1783_s7 = inlined_call_operand.hbm [shape: f32[2,8,32], index: 7, kind: output, shape index: {}]  }
   0x1   :  { %14 = vsyncpa [#allocation7 + $0x1], 0  ;;  %s1458_s24 = smov 0   ;;  %s1460_s25 = smov 0  }
   0x2   :  { %s1462_s26 = smov 0   ;;  %s1464_s27 = smov 0  }
   0x3 LB: > { %s1479_s28 = sadd.s32 4294967295, %s1391_s27   ;;  %s1064_s29 = sadd.s32 4294967294, %s1391_s27   ;;  %s1391_s27 = sphi %s1464_s27, %s1789_s27   ;;  %s1387_s26 = sphi %s1462_s26, %s1788_s26   ;;  %s1383_s25 = sphi %s1460_s25, %s1787_s25   ;;  %s1379_s24 = sphi %s1458_s24, %s1786_s24  }
   0x4   : > { %s1483_s30 = sadd.s32 1, %s1391_s27   ;;  %s184_s8 = sadd.s32 1, %s1387_s26 }
   0x5   : > { %s181_s9 = ssub.s32 %s1391_s27, %s1483_s30  ;;  %p194_p0 = scmp.ne.s32.totalorder %s1387_s26, %s1383_s25 }
   0x6   : > { %p182_p1 = scmp.eq.s32.totalorder %s181_s9, 0  ;;  %p195_p2 = scmp.eq.s32.totalorder %s1479_s28, 1 }
   0x7   : > { %p200_p3 = scmp.ne.s32.totalorder %s1383_s25, %s1379_s24  ;;  %p201_p4 = scmp.eq.s32.totalorder %s1064_s29, 1 }
   0x8   : > { %s1494_s10 = scalar_select %p182_p1, %s1387_s26, %s184_s8  }
   0x9   : > { %p1496_p5 = por %p195_p2, %p194_p0  ;;  %p1500_p6 = por %p201_p4, %p200_p3 }
   0xa   : > { %p1067_p7 = scmp.ge.s32.totalorder %s1391_s27, 1  ;;  %p247_p8 = scmp.lt.s32.totalorder %s1391_s27, 3 }
   0xc   : > { %p248_p9 = pnand %p1067_p7, %p247_p8 }
   0xd   : > { %s278_s13 = sand.u32 (!%p248_p9), 1, %s1383_s25   ;;  %v1510_v0 = vld [vmem:[%s1782_s6 + $0x1] ss:$0 sm:$0xff] (!%p248_p9)  ;;  %v1515_v1 = vld [vmem:[%s1782_s6 + $0x2] ss:$0 sm:$0xff] (!%p248_p9)  ;;  %v1397_v4 = vmov (!%p248_p9), 0.0|0.0  }
   0xe   : > { %251 = sbr.rel (%p248_p9) target bundleno = 2584 (0xa18), region = 48  ;;  %s1519_s18 = sshll.u32 (!%p248_p9), %s278_s13, 3  ;;  %v1524_v2 = vld [vmem:[%s1782_s6 + $0x3] ss:$0 sm:$0xff] (!%p248_p9)  ;;  %v1529_v3 = vld [vmem:[%s1782_s6 + $0x4] ss:$0 sm:$0xff] (!%p248_p9)  ;;  %1204 = vmatprep.subr.bf16.mxu0 (!%p248_p9), %v1397_v4 }
   0xf   : > { %v304_v5 = vld [vmem:[%s1778_s2] sm:$0xff] (!%p248_p9)  ;;  %v305_v8 = vld [vmem:[%s1778_s2 + $0x8] sm:$0xff] (!%p248_p9)  ;;  %v306_v11 = vld [vmem:[%s1778_s2 + $0x10] sm:$0xff] (!%p248_p9)  ;;  %vm1398_vm0 = vmmov (!%p248_p9), 0   ;;  %v1399_v13 = vmov (!%p248_p9), 0.0   ;;  %p281_p10 = scmp.lt.s32.totalorder (!%p248_p9), %s1479_s28, 1 }
  0x10   : > { %v1538_v6 = vld [vmem:[%s1782_s6 + $0x5] ss:$0 sm:$0xff] (!%p248_p9)  ;;  %v1543_v7 = vld [vmem:[%s1782_s6 + $0x6] ss:$0 sm:$0xff] (!%p248_p9)  ;;  %v1551_v9 = vld [vmem:[%s1782_s6 + $0x7] ss:$0 sm:$0xff] (!%p248_p9)  ;;  %v1205_v10 = vpack.c.bf16 (!%p248_p9), %v305_v8, %v304_v5  ;;  %1134 = vmatprep.mubr.msk.f32.mxu0 (!%p248_p9), %vm1398_vm0, %v1399_v13 }
  0x11   : > { %v307_v12 = vld [vmem:[%s1778_s2 + $0x18] sm:$0xff] (!%p248_p9)  ;;  %vm312_vm1 = vcmask (!%p248_p9), 261120   ;;  %v1071_v17 = vld [vmem:[%s1782_s6] ss:$0 sm:$0xff] (!%p248_p9)  ;;  %vm386_vm2 = vcmask (!%p248_p9), 64512   ;;  %s1400_s23 = smov (!%p248_p9), 120  }
  0x12   : > { %1206 = vmatpush3.bf16.msra.mxu0 (!%p248_p9), %v1205_v10  ;;  %v1208_v14 = vpack.c.bf16 (!%p248_p9), %v307_v12, %v306_v11  ;;  %s1401_s29 = smov (!%p248_p9), 96   ;;  %s1404_s14 = smov (!%p248_p9), 112  }
  0x13   : > { %1207 = vmatprep.subr.bf16.mxu0 (!%p248_p9), %v1397_v4  ;;  %s1405_s15 = smov (!%p248_p9), 56   ;;  %s1407_s17 = smov (!%p248_p9), 80  }
  0x14   : > { %s1408_s19 = smov (!%p248_p9), 72   ;;  %s1410_s21 = smov (!%p248_p9), 40  }
  0x15   : > { %s282_s8 = scalar_select %p281_p10, %s1479_s28, 1 }
  0x16   : > { %1209 = vmatpush3.bf16.msra.mxu0 %v1208_v14  ;;  %s280_s22 = scalar_lea.vmem [#allocation6], %s1519_s18 }
  0x17   : > { %s1069_s9 = sshll.u32 %s282_s8, 3  ;;  %s287_s16 = scalar_lea.vmem %s1777_s1, %s282_s8 }
  0x18   : > { %s284_s20 = scalar_lea.vmem %s1776_s0, %s1069_s9  ;;  %v1570_v15 = vld [vmem:[%s287_s16] ss:$0 sm:$0xff]  ;;  %s1402_s8 = smov 88  }
  0x19   : > { %v1572_v16 = vld [vmem:[%s284_s20] sm:$0xff]  ;;  %s1403_s9 = smov 64   ;;  %s1406_s16 = smov 48  }
  0x1a   : > { %1135 = vmatmul.mubr.msk.f32.vlgmr.msra.gmra.mrb[0].mxu0 %vm312_vm1, %v1572_v16  ;;  %s1409_s20 = smov 104  }
  0xed   : > { %v382_v18 = vpop.f32.mrb[0].mxu0 }
  0xee   : > { %v383_v19 = vadd.f32 %v1071_v17, %v382_v18  ;;  %v1136_v20 = vpop.f32.mrb[1].mxu0 }
  0xf0   : > { %397 = vrot.lane.b32.xlu1 %v383_v19, %s1400_s23  ;;  %389 = vrot.lane.b32.xlu0 %v383_v19, %s1401_s29  ;;  %387 = vst.msk [vmem:[#allocation2] sm:$0xff] %vm386_vm2, %v383_v19  ;;  %s1592_s23 = smov 0  }
  0xf4   : > { %402 = vrot.lane.b32.xlu1 %v383_v19, %s1402_s8  ;;  %393 = vrot.lane.b32.xlu0 %v383_v19, %s1403_s9 }
  0xf8   : > { %412 = vrot.lane.b32.xlu1 %v383_v19, %s1404_s14  ;;  %407 = vrot.lane.b32.xlu0 %v383_v19, %s1405_s15 }
  0xfc   : > { %422 = vrot.lane.b32.xlu1 %v383_v19, %s1406_s16  ;;  %417 = vrot.lane.b32.xlu0 %v383_v19, %s1407_s17 }
 0x100   : > { %432 = vrot.lane.b32.xlu1 %v383_v19, %s1408_s19  ;;  %427 = vrot.lane.b32.xlu0 %v383_v19, %s1409_s20 }
 0x104   : > { %437 = vrot.lane.b32.xlu0 %v383_v19, %s1410_s21 }
 0x162   : > { %v398_v21 = vpop.permute.xlu1 %397  ;;  %v390_v22 = vpop.permute.xlu0 %389 }
 0x163   : > { %401 = vst.msk [vmem:[#allocation2 + $0x8] sm:$0xff] %vm386_vm2, %v398_v21  ;;  %392 = vst.msk [vmem:[#allocation3] sm:$0xff] %vm386_vm2, %v390_v22 }
 0x166   : > { %v403_v23 = vpop.permute.xlu1 %402  ;;  %v394_v24 = vpop.permute.xlu0 %393 }
 0x167   : > { %406 = vst.msk [vmem:[#allocation3 + $0x8] sm:$0xff] %vm386_vm2, %v403_v23  ;;  %396 = vst.msk [vmem:[#allocation4] sm:$0xff] %vm386_vm2, %v394_v24 }
 0x16a   : > { %v413_v25 = vpop.permute.xlu1 %412  ;;  %v408_v26 = vpop.permute.xlu0 %407 }
 0x16b   : > { %416 = vst.msk [vmem:[#allocation2 + $0x10] sm:$0xff] %vm386_vm2, %v413_v25  ;;  %411 = vst.msk [vmem:[#allocation4 + $0x8] sm:$0xff] %vm386_vm2, %v408_v26 }
 0x16e   : > { %v423_v27 = vpop.permute.xlu1 %422  ;;  %v418_v28 = vpop.permute.xlu0 %417 }
 0x16f   : > { %426 = vst.msk [vmem:[#allocation4 + $0x10] sm:$0xff] %vm386_vm2, %v423_v27  ;;  %421 = vst.msk [vmem:[#allocation3 + $0x10] sm:$0xff] %vm386_vm2, %v418_v28 }
 0x172   : > { %v433_v29 = vpop.permute.xlu1 %432  ;;  %v428_v30 = vpop.permute.xlu0 %427 }
 0x173   : > { %436 = vst.msk [vmem:[#allocation3 + $0x18] sm:$0xff] %vm386_vm2, %v433_v29  ;;  %431 = vst.msk [vmem:[#allocation2 + $0x18] sm:$0xff] %vm386_vm2, %v428_v30 }
 0x176   : > { %v438_v31 = vpop.permute.xlu0 %437 }
 0x177   : > { %441 = vst.msk [vmem:[#allocation4 + $0x18] sm:$0xff] %vm386_vm2, %v438_v31 }
 0x178 LB: >> { %v1411_v32 = vmov 0.0   ;;  %vm1412_vm3 = vmmov 0   ;;  %s1598_s29 = sshll.u32 %s1395_s23, 3  ;;  %s447_s23 = sadd.s32 1, %s1395_s23   ;;  %s1395_s23 = sphi %s1592_s23, %s447_s23  }
 0x179   : >> { %1137 = vmatprep.subr.mxu0 %v1411_v32  ;;  %1139 = vmatprep.mubr.msk.f32.mxu0 %vm1412_vm3, %v1411_v32  ;;  %s451_s8 = scalar_lea.vmem [#allocation3], %s1598_s29  ;;  %s449_s9 = scalar_lea.vmem [#allocation2], %s1598_s29 }
 0x17a   : >> { %1142 = vmatprep.subr.mxu1 %v1411_v32  ;;  %1144 = vmatprep.mubr.msk.f32.mxu1 %vm1412_vm3, %v1411_v32  ;;  %v452_v33 = vld [vmem:[%s451_s8] sm:$0xff]  ;;  %s540_s14 = scalar_lea.vmem [#allocation4], %s1598_s29  ;;  %s615_s15 = scalar_lea.vmem [#allocation5], %s1598_s29 }
 0x17b   : >> { %1138 = vmatpush3.xpose.msk.msra.mxu0 %vm386_vm2, %v452_v33  ;;  %v450_v34 = vld [vmem:[%s449_s9] sm:$0xff]  ;;  %p444_p11 = scmp.ge.s32.totalorder %s447_s23, 4  }
 0x17c   : > { %s1413_s16 = smov (%p444_p11), 8   ;;  %v641_v52 = vld [vmem:[%s1779_s3] sm:$0xff] (%p444_p11)  ;;  %v642_v53 = vld [vmem:[%s1779_s3 + $0x8] sm:$0xff] (%p444_p11)  ;;  %1222 = vmatprep.subr.bf16.mxu0 (%p444_p11), %v1397_v4  ;;  %s1414_s23 = smov (%p444_p11), 24   ;;  %v643_v56 = vld [vmem:[%s1779_s3 + $0x10] sm:$0xff] (%p444_p11)  ;;  %vm637_vm4 = vcmask (%p444_p11), 130048  }
 0x17d   : > { %v1211_v55 = vpack.c.bf16 (%p444_p11), %v642_v53, %v641_v52  ;;  %v644_v57 = vld [vmem:[%s1779_s3 + $0x18] sm:$0xff] (%p444_p11)  ;;  %vm639_vm5 = vcmask (%p444_p11), 195584   ;;  %v854_v32 = vld [vmem:[%s1781_s5] sm:$0xff] (%p444_p11)  ;;  %v855_v33 = vld [vmem:[%s1781_s5 + $0x8] sm:$0xff] (%p444_p11)  ;;  %s1087_s8 = sshll.u32 (%p444_p11), %s1479_s28, 7  ;;  %s983_s9 = sshll.u32 (%p444_p11), %s280_s22, 4  ;;  %s1731_s9 = int_to_ptr.vmem [resolvable:$true] %s983_s9 }
 0x17e   : >> { %1140 = vmatmul.mubr.msk.f32.vlgmr.msra.gmra.mrb[0].mxu0 %vm386_vm2, %v450_v34  ;;  %v541_v44 = vld [vmem:[%s540_s14] sm:$0xff]  ;;  %v1214_v58 = vpack.c.bf16 (%p444_p11), %v644_v57, %v643_v56  ;;  %v750_v23 = vld [vmem:[%s1780_s4 + $0x18] sm:$0xff] (%p444_p11)  ;;  %v856_v34 = vld [vmem:[%s1781_s5 + $0x10] sm:$0xff] (%p444_p11)  ;;  %s970_s28 = scalar_lea.sflag (%p444_p11), [#allocation7], %s278_s13  ;;  %s1325_s17 = scalar_lea.vmem (%p444_p11), %s1731_s9, 128 }
 0x17f   : >> { %1143 = vmatpush3.msra.mxu1 %v541_v44  ;;  %1201 = vmatprep.mubr.msk.f32.mxu0 (%p444_p11), %vm1398_vm0, %v1399_v13  ;;  %v869_v52 = vld [vmem:[%s1781_s5 + $0x78] sm:$0xff] (%p444_p11)  ;;  %p1326_p12 = scmp.ne.s32.totalorder (%p444_p11), %s1731_s9, %s1325_s17  ;;  %s1417_s19 = smov (%p444_p11), [#allocation6]  }
 0x180   : > { %1210 = vmatprep.subr.bf16.mxu1 (%p444_p11), %v1397_v4  ;;  %s1329_s20 = sshll.u32 (%p444_p11), %s1417_s19, 4  ;;  %s1330_s20 = int_to_ptr.vmem [resolvable:$false] %s1329_s20 }
 0x181   : > { %p1327_p13 = pnand (%p444_p11), %p1326_p12, %p1496_p5  ;;  %s1331_s21 = scalar_lea.vmem (%p444_p11), %s1330_s20, 256 }
 0x182   : > { %p1332_p1 = scmp.lt.s32.totalorder (%p444_p11), %s1731_s9, %s1330_s20  ;;  %p1333_p2 = scmp.lt.s32.totalorder (%p444_p11), %s1331_s21, %s1325_s17 }
 0x183   : > { %p1328_p0 = pneg (%p444_p11), %p1327_p13 }
 0x184   : > { %p1334_p3 = por (%p444_p11), %p1333_p2, %p1332_p1 }
 0x186   : > { %p1335_p4 = pnand (%p444_p11), %p1334_p3, %p1328_p0 }
 0x251   : >> { %v525_v35 = vpop.f32.mrb[0].mxu0 }
 0x252   : >> { %v526_v36 = vadd.f32 %v1570_v15, %v525_v35  ;;  %v1141_v37 = vpop.f32.mrb[1].mxu0  ;;  %v1223_v35 = vpack.c.bf16 (%p444_p11), %v855_v33, %v854_v32 }
 0x253   : > { %v859_v37 = vld [vmem:[%s1781_s5 + $0x28] sm:$0xff] (%p444_p11) }
 0x254   : >> { %v529_v38 = vsel %vm386_vm2, %v526_v36, -inf  ;;  %1224 = vmatpush3.bf16.msra.mxu0 (%p444_p11), %v1223_v35 }
 0x255   : >> { %530 = vmax.xlane.f32.xlu0 %v529_v38  ;;  %1225 = vmatprep.subr.bf16.mxu0 (%p444_p11), %v1397_v4 }
 0x2e2   : >> { %v531_v39 = vpop.xlane.xlu0 %530 }
 0x2e3   : >> { %v532_v40 = vsub.f32 %v526_v36, %v531_v39  ;;  %v858_v36 = vld [vmem:[%s1781_s5 + $0x20] sm:$0xff] (%p444_p11)  ;;  %v860_v39 = vld [vmem:[%s1781_s5 + $0x30] sm:$0xff] (%p444_p11) }
 0x2e4   : > { %v1229_v38 = vpack.c.bf16 (%p444_p11), %v859_v37, %v858_v36 }
 0x2e5   : >> { %v533_v41 = vmul.f32 1.442695, %v532_v40  ;;  %v861_v40 = vld [vmem:[%s1781_s5 + $0x38] sm:$0xff] (%p444_p11) }
 0x2e7   : >> { %1313 = vpow2.f32 %v533_v41  ;;  %v1232_v41 = vpack.c.bf16 (%p444_p11), %v861_v40, %v860_v39 }
 0x2f1   : >> { %v1314_v42 = vpop.eup %1313 }
 0x2f2   : >> { %v535_v43 = vsel %vm386_vm2, %v1314_v42, 0.0 }
 0x2f3   : >> { %536 = vadd.xlane.f32.xlu0 %v535_v43  ;;  %v863_v43 = vld [vmem:[%s1781_s5 + $0x48] sm:$0xff] (%p444_p11) }
 0x380   : >> { %v537_v45 = vpop.xlane.xlu0 %536 }
 0x381   : >> { %1315 = vrcp.f32 %v537_v45  ;;  %v864_v45 = vld [vmem:[%s1781_s5 + $0x50] sm:$0xff] (%p444_p11) }
 0x38b   : >> { %v1316_v46 = vpop.eup %1315 }
 0x38c   : >> { %v539_v47 = vmul.f32 %v1316_v46, %v1314_v42  ;;  %v862_v42 = vld [vmem:[%s1781_s5 + $0x40] sm:$0xff] (%p444_p11)  ;;  %v865_v46 = vld [vmem:[%s1781_s5 + $0x58] sm:$0xff] (%p444_p11) }
 0x38d   : > { %v1235_v44 = vpack.c.bf16 (%p444_p11), %v863_v43, %v862_v42 }
 0x38e   : >> { %1145 = vmatmul.mubr.msk.f32.vlgmr.msra.gmra.mrb[0].mxu1 %vm386_vm2, %v539_v47  ;;  %v1238_v47 = vpack.c.bf16 (%p444_p11), %v865_v46, %v864_v45 }
 0x38f   : > { %1155 = vmatprep.mubr.msk.f32.mxu1 (%p444_p11), %vm1398_vm0, %v1399_v13  ;;  %1212 = vmatpush3.bf16.msra.mxu1 (%p444_p11), %v1211_v55 }
 0x390   : > { %1213 = vmatprep.subr.bf16.mxu1 (%p444_p11), %v1397_v4 }
 0x393   : > { %1215 = vmatpush3.bf16.msra.mxu1 (%p444_p11), %v1214_v58 }
 0x394   : > { %1216 = vmatprep.subr.bf16.mxu1 (%p444_p11), %v1397_v4 }
 0x45c   : > { %446 = sbr.rel (!%p444_p11) target bundleno = 376 (0x178), region = 109 }
 0x461   : >> { %v611_v48 = vpop.f32.mrb[0].mxu1 }
 0x462   : >> { %616 = vst.msk [vmem:[%s615_s15] sm:$0xff] %vm386_vm2, %v611_v48  ;;  %v1146_v49 = vpop.f32.mrb[1].mxu1  ;;  %s1415_s15 = smov (%p444_p11), 16   ;;  %v866_v48 = vld [vmem:[%s1781_s5 + $0x60] sm:$0xff] (%p444_p11) }
 0x463   : > { %v867_v49 = vld [vmem:[%s1781_s5 + $0x68] sm:$0xff] }
 0x469   : > { %v619_v50 = vld [vmem:[#allocation5 + $0x8] sm:$0xff]  ;;  %v623_v51 = vld [vmem:[#allocation5 + $0x18] sm:$0xff]  ;;  %v621_v54 = vld [vmem:[#allocation5 + $0x10] sm:$0xff] }
 0x46a   : > { %625 = vrot.lane.b32.xlu0 %v619_v50, %s1413_s16  ;;  %633 = vrot.lane.b32.xlu1 %v623_v51, %s1414_s23  ;;  %v617_v60 = vld [vmem:[#allocation5] sm:$0xff]  ;;  %v1241_v50 = vpack.c.bf16 %v867_v49, %v866_v48  ;;  %v868_v51 = vld [vmem:[%s1781_s5 + $0x70] sm:$0xff]  ;;  %s1729_s16 = scalar_lea.hbm %s1783_s7, %s1087_s8 }
 0x46b   : > { %v1244_v53 = vpack.c.bf16 %v869_v52, %v868_v51 }
 0x46e   : > { %629 = vrot.lane.b32.xlu0 %v621_v54, %s1415_s15 }
 0x4dc   : > { %v626_v59 = vpop.permute.xlu0 %625  ;;  %v634_v61 = vpop.permute.xlu1 %633 }
 0x4dd   : > { %v636_v62 = vsel %vm386_vm2, %v617_v60, %v626_v59 }
 0x4e0   : > { %v630_v63 = vpop.permute.xlu0 %629 }
 0x4e1   : > { %v638_v5 = vsel %vm637_vm4, %v636_v62, %v630_v63 }
 0x4e2   : > { %v640_v8 = vsel %vm639_vm5, %v638_v5, %v634_v61 }
 0x4e3   : > { %1156 = vmatmul.mubr.msk.f32.vlgmr.msra.gmra.mrb[0].mxu1 %vm312_vm1, %v640_v8 }
 0x4e4   : > { %1166 = vmatprep.mubr.msk.f32.mxu1 %vm1398_vm0, %v1399_v13  ;;  %v747_v13 = vld [vmem:[%s1780_s4] sm:$0xff] }
 0x5b6   : > { %v718_v10 = vpop.f32.mrb[0].mxu1 }
 0x5b7   : > { %v719_v11 = vadd.f32 %v1510_v0, %v718_v10  ;;  %v1157_v12 = vpop.f32.mrb[1].mxu1  ;;  %v748_v0 = vld [vmem:[%s1780_s4 + $0x8] sm:$0xff] }
 0x5b8   : > { %v1217_v22 = vpack.c.bf16 %v748_v0, %v747_v13 }
 0x5b9   : > { %v722_v14 = vadd.f32 %v719_v11, %v1572_v16  ;;  %v749_v16 = vld [vmem:[%s1780_s4 + $0x10] sm:$0xff] }
 0x5ba   : > { %1218 = vmatpush3.bf16.msra.mxu1 %v1217_v22  ;;  %v1220_v24 = vpack.c.bf16 %v750_v23, %v749_v16 }
 0x5bb   : > { %v723_v15 = vsel %vm312_vm1, %v722_v14, 0.0  ;;  %1219 = vmatprep.subr.bf16.mxu1 %v1397_v4 }
 0x5bc   : > { %724 = vadd.xlane.f32.xlu1 %v723_v15 }
 0x5be   : > { %1221 = vmatpush3.bf16.msra.mxu1 %v1220_v24 }
 0x649   : > { %v725_v17 = vpop.xlane.xlu1 %724 }
 0x64a   : > { %v727_v18 = vmul.f32 0.03125, %v725_v17 }
 0x64c   : > { %v728_v19 = vsub.f32 %v722_v14, %v727_v18 }
 0x64e   : > { %v729_v20 = vmul.f32 %v728_v19, %v728_v19 }
 0x650   : > { %v730_v21 = vsel %vm312_vm1, %v729_v20, 0.0 }
 0x651   : > { %731 = vadd.xlane.f32.xlu0 %v730_v21  ;;  %v1416_v21 = vmov -1.0  }
 0x6de   : > { %v732_v25 = vpop.xlane.xlu0 %731 }
 0x6df   : > { %v733_v26 = vmul.f32 0.03125, %v732_v25 }
 0x6e1   : > { %v734_v27 = vadd.f32 1e-12, %v733_v26 }
 0x6e3   : > { %1317 = vrsqrt.f32 %v734_v27 }
 0x6ed   : > { %v1318_v28 = vpop.eup %1317 }
 0x6ee   : > { %v736_v29 = vmul.f32 %v1318_v28, %v728_v19 }
 0x6f0   : > { %v741_v30 = vmul.f32 %v1515_v1, %v736_v29  ;;  %v857_v1 = vld [vmem:[%s1781_s5 + $0x18] sm:$0xff] }
 0x6f2   : > { %v1657_v31 = vadd.f32 %v1524_v2, %v741_v30  ;;  %v1226_v2 = vpack.c.bf16 %v857_v1, %v856_v34 }
 0x6f4   : > { %1167 = vmatmul.mubr.msk.f32.vlgmr.msra.gmra.mrb[2].mxu1 %vm312_vm1, %v1657_v31  ;;  %1227 = vmatpush3.bf16.msra.mxu0 %v1226_v2 }
 0x6f5   : > { %1228 = vmatprep.subr.bf16.mxu0 %v1397_v4 }
 0x6f8   : > { %1230 = vmatpush3.bf16.msra.mxu0 %v1229_v38 }
 0x6f9   : > { %1231 = vmatprep.subr.bf16.mxu0 %v1397_v4 }
 0x6fc   : > { %1233 = vmatpush3.bf16.msra.mxu0 %v1232_v41 }
 0x6fd   : > { %1234 = vmatprep.subr.bf16.mxu0 %v1397_v4 }
 0x700   : > { %1236 = vmatpush3.bf16.msra.mxu0 %v1235_v44 }
 0x701   : > { %1237 = vmatprep.subr.bf16.mxu0 %v1397_v4 }
 0x704   : > { %1239 = vmatpush3.bf16.msra.mxu0 %v1238_v47 }
 0x705   : > { %1240 = vmatprep.subr.bf16.mxu0 %v1397_v4 }
 0x708   : > { %1242 = vmatpush3.bf16.msra.mxu0 %v1241_v50 }
 0x709   : > { %1243 = vmatprep.subr.bf16.mxu0 %v1397_v4 }
 0x70c   : > { %1245 = vmatpush3.bf16.msra.mxu0 %v1244_v53 }
 0x7c7   : > { %v824_v54 = vpop.f32.mrb[2].mxu1 }
 0x7c8   : > { %v825_v55 = vadd.f32 %v1529_v3, %v824_v54  ;;  %v1168_v56 = vpop.f32.mrb[3].mxu1 }
 0x7ca   : > { %v829_v57 = vmul.f32 0.70710677, %v825_v55  ;;  %v828_v16 = vmul.f32 0.5, %v825_v55 }
 0x7cc   : > { %v832_v58 = vand.u32 2147483647, %v829_v57  ;;  %vm830_vm6 = vcmp.ge.f32.partialorder %v829_v57, 0.0 }
 0x7cd   : > { %v831_v13 = vsel %vm830_vm6, 1.0, %v1416_v21 }
 0x7ce   : > { %v833_v59 = vmul.f32 0.3275911, %v832_v58  ;;  %v845_v61 = vsub.f32 0.0, %v832_v58 }
 0x7d0   : > { %v834_v60 = vadd.f32 1.0, %v833_v59  ;;  %v846_v63 = vmul.f32 %v845_v61, %v832_v58 }
 0x7d2   : > { %1319 = vrcp.f32 %v834_v60  ;;  %v847_v10 = vmul.f32 1.442695, %v846_v63 }
 0x7d4   : > { %1321 = vpow2.f32 %v847_v10 }
 0x7dc   : > { %v1320_v62 = vpop.eup %1319 }
 0x7dd   : > { %v836_v5 = vmul.f32 1.0614054, %v1320_v62 }
 0x7de   : > { %v1322_v18 = vpop.eup %1321 }
 0x7df   : > { %v837_v8 = vadd.f32 -1.4531521, %v836_v5 }
 0x7e1   : > { %v838_v11 = vmul.f32 %v1320_v62, %v837_v8 }
 0x7e3   : > { %v839_v12 = vadd.f32 1.4214138, %v838_v11 }
 0x7e5   : > { %v840_v4 = vmul.f32 %v1320_v62, %v839_v12 }
 0x7e7   : > { %v841_v14 = vadd.f32 -0.28449672, %v840_v4 }
 0x7e9   : > { %v842_v15 = vmul.f32 %v1320_v62, %v841_v14 }
 0x7eb   : > { %v843_v17 = vadd.f32 0.2548296, %v842_v15 }
 0x7ed   : > { %v844_v3 = vmul.f32 %v1320_v62, %v843_v17 }
 0x7ef   : > { %v849_v19 = vmul.f32 %v1322_v18, %v844_v3 }
 0x7f1   : > { %v850_v20 = vsub.f32 1.0, %v849_v19 }
 0x7f3   : > { %v851_v0 = vmul.f32 %v850_v20, %v831_v13 }
 0x7f5   : > { %v852_v22 = vadd.f32 1.0, %v851_v0 }
 0x7f7   : > { %v853_v23 = vmul.f32 %v852_v22, %v828_v16 }
 0x7f9   : > { %1202 = vmatmul.mubr.f32.vlgmr.msra.gmra.mrb[0].mxu0 %v853_v23 }
 0x8cc   : > { %v940_v24 = vpop.f32.mrb[0].mxu0 }
 0x8cd   : > { %v941_v25 = vadd.f32 %v1538_v6, %v940_v24  ;;  %v1203_v26 = vpop.f32.mrb[1].mxu0 }
 0x8cf   : > { %v944_v27 = vadd.f32 %v941_v25, %v1657_v31 }
 0x8d1   : > { %v945_v28 = vsel %vm312_vm1, %v944_v27, 0.0 }
 0x8d2   : > { %946 = vadd.xlane.f32.xlu0 %v945_v28 }
 0x95f   : > { %v947_v29 = vpop.xlane.xlu0 %946 }
 0x960   : > { %v948_v30 = vmul.f32 0.03125, %v947_v29 }
 0x962   : > { %v949_v32 = vsub.f32 %v944_v27, %v948_v30 }
 0x964   : > { %v950_v33 = vmul.f32 %v949_v32, %v949_v32 }
 0x966   : > { %v951_v34 = vsel %vm312_vm1, %v950_v33, 0.0 }
 0x967   : > { %952 = vadd.xlane.f32.xlu1 %v951_v34 }
 0x9f4   : > { %v953_v35 = vpop.xlane.xlu1 %952 }
 0x9f5   : > { %v954_v6 = vmul.f32 0.03125, %v953_v35 }
 0x9f7   : > { %v955_v1 = vadd.f32 1e-12, %v954_v6 }
 0x9f9   : > { %1323 = vrsqrt.f32 %v955_v1 }
 0xa03   : > { %v1324_v2 = vpop.eup %1323 }
 0xa04   : > { %v957_v31 = vmul.f32 %v1324_v2, %v949_v32 }
 0xa06   : > { %v962_v36 = vmul.f32 %v1543_v7, %v957_v31 }
 0xa08   : > { %v967_v37 = vadd.f32 %v1551_v9, %v962_v36 }
 0xa0a   : > { %968 = vst.msk [vmem:[%s280_s22] sm:$0xff] %vm312_vm1, %v967_v37 }
 0xa0b   : > { %1338 = shalt.err (!%p1335_p4)
}
 0xa0c   : > { %s1339_s13 = scalar_lea.hbm %s1729_s16, 128  ;;  %s1343_s23 = scalar_lea.hbm %s1783_s7, 256 }
 0xa0d   : > { %p1340_p7 = scmp.ne.s32.totalorder %s1729_s16, %s1339_s13  ;;  %p1344_p10 = scmp.lt.u32.totalorder %s1729_s16, %s1783_s7 }
 0xa0e   : > { %p1345_p11 = scmp.lt.u32.totalorder %s1343_s23, %s1339_s13  ;;  %p1347_p13 = scmp.lt.u32.totalorder %s1339_s13, %s1729_s16 }
 0xa0f   : > { %p1341_p8 = pnand %p1340_p7, %p1496_p5 }
 0xa10   : > { %p1346_p12 = por %p1345_p11, %p1344_p10 }
 0xa11   : > { %p1342_p9 = pneg %p1341_p8 }
 0xa12   : > { %p1348_p0 = por %p1347_p13, %p1346_p12 }
 0xa14   : > { %p1349_p1 = pnand %p1348_p0, %p1342_p9 }
 0xa16   : > { %1352 = shalt.err (!%p1349_p1)
}
 0xa17   : > { %1246 = dma.vmem_to_hbm [thread:$0]  (%p1496_p5), %s1731_s9, 128, %s1729_s16, %s970_s28  }
 0xa18 PF: > { %p1252_p2 = scmp.ge.s32.totalorder %s1391_s27, 2  ;;  %s995_s14 = sand.u32 1, %s1379_s24  }
 0xa19   : > { %s996_s15 = scalar_lea.sflag [#allocation7], %s995_s14 }
 0xa1a   : > { %p1249_p3 = pnand %p1252_p2, %p1500_p6 }
 0xa1c   : > { %1374 = dma.done.wait (!%p1249_p3), %s996_s15, 128  }
 0xa1d   : > { %1376 = vsyncadd (!%p1249_p3), %s996_s15, 4294967168  ;;  %p17_p4 = scmp.ge.s32.totalorder %s1483_s30, 4   ;;  %s1786_s24 = smov %s1383_s25 }
 0xa1e   : > { %s1787_s25 = smov %s1387_s26  ;;  %s1788_s26 = smov %s1494_s10 }
 0xa1f   : > { %s1789_s27 = smov %s1483_s30  ;;  %19 = sbr.rel (!%p17_p4) target bundleno = 3 (0x3), region = 120 }
 0xa26   :  { %1001 = vsyncpa [#allocation7], 1 }
 0xa27   :  { %1003 = vsyncpa [#allocation7 + $0x1], 1 }

</bundles_post_ra>
